<compile_context>
chip_gen: v7x
topology: tpu7x:2x2x1
jax: 0.10.0
libtpu: 0.0.40
codegen_flags: <defaults>
</compile_context>

<pallas_src>
import functools

import jax
import jax.numpy as jnp
from jax.experimental import pallas as pl
from jax.experimental.pallas import tpu as pltpu

EPS = 1e-5
LANE = 128


def _round_up(x, m):
    return (x + m - 1) // m * m


def _vmem_limit(per_step_bytes):
    # Pipeline double-buffers each block; add headroom, clamp to a budget that
    # is safe on v5e/v6e (128 MiB physical) and v7x (64 MiB per TensorCore).
    need = 2 * per_step_bytes + (4 << 20)
    return int(min(max(need, 32 << 20), 64 << 20))


# ------------------------------ Pallas kernels ------------------------------ #

def _make_conv_stats_kernel(n_mm):
    """conv-as-matmul for n_mm (patches, weight) pairs; per-channel sum and
    sum-of-squares accumulated across the M grid axis into (2, C) outputs."""

    def kernel(*refs):
        p_refs = refs[0:2 * n_mm:2]
        w_refs = refs[1:2 * n_mm:2]
        y_refs = refs[2 * n_mm:3 * n_mm]
        s_refs = refs[3 * n_mm:4 * n_mm]

        @pl.when(pl.program_id(0) == 0)
        def _():
            for s in s_refs:
                s[...] = jnp.zeros_like(s)

        for t in range(n_mm):
            # bf16 operands, f32 accumulation on the MXU.
            y = jnp.dot(p_refs[t][...], w_refs[t][...],
                        preferred_element_type=jnp.float32)
            y_refs[t][...] = y
            # Single pass over y: sum and sum-of-squares (var = E[y^2]-mean^2).
            s_refs[t][...] += jnp.concatenate(
                [jnp.sum(y, axis=0, keepdims=True),
                 jnp.sum(y * y, axis=0, keepdims=True)], axis=0)

    return kernel


def conv_stats_pallas(pw_pairs, m_pad, c_pad, tm):
    """pw_pairs: [(patches (m_pad, K_t) bf16, weight (K_t, c_pad) bf16), ...].
    Returns ([y_t (m_pad, c_pad) f32], [stats_t (2, c_pad) f32])."""
    n_mm = len(pw_pairs)
    grid = (m_pad // tm,)
    in_specs, args = [], []
    step_bytes, flops = 0, 0
    for p, w in pw_pairs:
        k = p.shape[1]
        in_specs.append(pl.BlockSpec((tm, k), lambda i: (i, 0)))
        in_specs.append(pl.BlockSpec((k, c_pad), lambda i: (0, 0)))
        args += [p, w]
        step_bytes += (tm * k + k * c_pad) * 2 + tm * c_pad * 4 + 2 * c_pad * 4
        flops += 2 * m_pad * k * c_pad
    out_shape = tuple(
        [jax.ShapeDtypeStruct((m_pad, c_pad), jnp.float32)] * n_mm
        + [jax.ShapeDtypeStruct((2, c_pad), jnp.float32)] * n_mm)
    out_specs = tuple(
        [pl.BlockSpec((tm, c_pad), lambda i: (i, 0))] * n_mm
        + [pl.BlockSpec((2, c_pad), lambda i: (0, 0))] * n_mm)
    bytes_accessed = (sum(a.size * a.dtype.itemsize for a in args)
                      + n_mm * (m_pad + 2) * c_pad * 4)

    outs = pl.pallas_call(
        _make_conv_stats_kernel(n_mm),
        grid=grid,
        out_shape=out_shape,
        in_specs=in_specs,
        out_specs=out_specs,
        compiler_params=pltpu.CompilerParams(
            # stats accumulator is resident across the M axis -> "arbitrary"
            dimension_semantics=("arbitrary",),
            vmem_limit_bytes=_vmem_limit(step_bytes)),
        cost_estimate=pl.CostEstimate(flops=int(flops), transcendentals=0,
                                      bytes_accessed=int(bytes_accessed)),
    )(*args)
    return list(outs[:n_mm]), list(outs[n_mm:])


def _make_bn_apply_kernel(n_bn, has_residual, apply_relu, inv_m):
    """Apply train-mode BN for n_bn conv outputs (summing the normalized
    results), optionally add a plain residual, optionally ReLU. All f32."""

    def kernel(*refs):
        y_refs = refs[0:3 * n_bn:3]
        s_refs = refs[1:3 * n_bn:3]
        gb_refs = refs[2:3 * n_bn:3]
        r_ref = refs[3 * n_bn] if has_residual else None
        out_ref = refs[-1]

        acc = None
        for t in range(n_bn):
            s = s_refs[t][...]
            gb = gb_refs[t][...]
            mean = s[0:1, :] * inv_m
            var = jnp.maximum(s[1:2, :] * inv_m - mean * mean, 0.0)
            scale = jax.lax.rsqrt(var + EPS) * gb[0:1, :]
            z = (y_refs[t][...] - mean) * scale + gb[1:2, :]
            acc = z if acc is None else acc + z
        if has_residual:
            acc = acc + r_ref[...]
        if apply_relu:
            acc = jnp.maximum(acc, 0.0)
        out_ref[...] = acc.astype(out_ref.dtype)

    return kernel


def bn_apply_pallas(bn_inputs, residual, apply_relu, m_true, tm):
    """bn_inputs: [(y (m_pad,c_pad) f32, stats (2,c_pad) f32, gb (2,c_pad) f32)]."""
    m_pad, c_pad = bn_inputs[0][0].shape
    n_bn = len(bn_inputs)
    grid = (m_pad // tm,)
    in_specs, args = [], []
    for y, s, gb in bn_inputs:
        in_specs += [pl.BlockSpec((tm, c_pad), lambda i: (i, 0)),
                     pl.BlockSpec((2, c_pad), lambda i: (0, 0)),
                     pl.BlockSpec((2, c_pad), lambda i: (0, 0))]
        args += [y, s, gb]
    if residual is not None:
        in_specs.append(pl.BlockSpec((tm, c_pad), lambda i: (i, 0)))
        args.append(residual)

    step_bytes = ((n_bn + 1 + int(residual is not None)) * tm * c_pad * 4
                  + n_bn * 4 * c_pad * 4)
    bytes_accessed = (sum(a.size * a.dtype.itemsize for a in args)
                      + m_pad * c_pad * 4)

    return pl.pallas_call(
        _make_bn_apply_kernel(n_bn, residual is not None, apply_relu,
                              1.0 / float(m_true)),
        grid=grid,
        out_shape=jax.ShapeDtypeStruct((m_pad, c_pad), jnp.float32),
        in_specs=in_specs,
        out_specs=pl.BlockSpec((tm, c_pad), lambda i: (i, 0)),
        compiler_params=pltpu.CompilerParams(
            dimension_semantics=("parallel",),   # pure elementwise over M tiles
            vmem_limit_bytes=_vmem_limit(step_bytes)),
        cost_estimate=pl.CostEstimate(
            flops=int(8 * n_bn * m_pad * c_pad),
            transcendentals=int(n_bn * c_pad),
            bytes_accessed=int(bytes_accessed)),
    )(*args)


# --------------------------------- JAX glue --------------------------------- #

def _im2col_3x3(x, stride):
    """x: (N,H,W,C) -> (N*Ho*Wo, 9*C), patch order (ky,kx,cin), padding=1."""
    # TODO(synk): for large feature maps, build the 9 shifted (TM,Cin)@(Cin,Cout)
    # products inside the kernel (halo rows via BlockSpec / manual DMA) instead
    # of materializing the 9x im2col matrix in HBM.
    N, H, W, C = x.shape
    Ho = (H - 1) // stride + 1
    Wo = (W - 1) // stride + 1
    xp = jnp.pad(x, ((0, 0), (1, 1), (1, 1), (0, 0)))
    cols = []
    for ky in range(3):
        for kx in range(3):
            cols.append(xp[:, ky:ky + (Ho - 1) * stride + 1:stride,
                              kx:kx + (Wo - 1) * stride + 1:stride, :])
    patches = jnp.concatenate(cols, axis=-1)          # (N, Ho, Wo, 9*C)
    return patches.reshape(N * Ho * Wo, 9 * C), (N, Ho, Wo)


def _pad_rows(a, m_pad):
    return jnp.pad(a, ((0, m_pad - a.shape[0]), (0, 0)))


def prepare_params(params, cout):
    """One-time conversion of PyTorch-layout params into channel-padded bf16
    matmul weights and packed (gamma; beta) rows (hoisted off the hot path)."""
    c_pad = _round_up(max(cout, LANE), LANE)

    def w3x3(w):  # (Cout, Cin, 3, 3) -> (9*Cin, c_pad); row = (ky*3+kx)*Cin+cin
        cin = w.shape[1]
        m = jnp.transpose(w, (2, 3, 1, 0)).reshape(9 * cin, cout)
        return jnp.pad(m, ((0, 0), (0, c_pad - cout))).astype(jnp.bfloat16)

    def gb(g, b):  # -> (2, c_pad): row0 gamma (pad with 1), row1 beta (pad with 0)
        return jnp.stack(
            [jnp.pad(g, (0, c_pad - cout), constant_values=1.0),
             jnp.pad(b, (0, c_pad - cout))], axis=0).astype(jnp.float32)

    prep = {"w1": w3x3(params["w1"]), "gb1": gb(params["g1"], params["b1"]),
            "w2": w3x3(params["w2"]), "gb2": gb(params["g2"], params["b2"])}
    if "w_sc" in params:
        w = jnp.transpose(params["w_sc"][:, :, 0, 0], (1, 0))   # (Cin, Cout)
        prep["w_sc"] = jnp.pad(w, ((0, 0), (0, c_pad - cout))).astype(jnp.bfloat16)
        prep["gb_sc"] = gb(params["g_sc"], params["b_sc"])
    return prep


def residual_block_forward(x_nhwc, prep, *, stride, cout, tm=256):
    """Pallas forward of ResidualBlock. x_nhwc: (N,H,W,Cin) f32 -> (N,Ho,Wo,Cout)."""
    N, H, W, cin = x_nhwc.shape
    c_pad = prep["w1"].shape[1]
    has_proj = "w_sc" in prep

    Ho = (H - 1) // stride + 1
    Wo = (W - 1) // stride + 1
    M = N * Ho * Wo
    tm = min(_round_up(tm, 8), _round_up(M, 8))
    m_pad = _round_up(M, tm)

    # ---- conv1 (stats pass) ----
    p1, _ = _im2col_3x3(x_nhwc, stride)
    p1 = _pad_rows(p1, m_pad).astype(jnp.bfloat16)
    (y1,), (s1,) = conv_stats_pallas([(p1, prep["w1"])], m_pad, c_pad, tm)
    # ---- bn1 + relu (apply pass) ----
    out1 = bn_apply_pallas([(y1, s1, prep["gb1"])], None, True, M, tm)
    out1_nhwc = out1[:M, :cout].reshape(N, Ho, Wo, cout)

    # ---- conv2 (+ fused projection shortcut) stats pass ----
    p2, _ = _im2col_3x3(out1_nhwc, 1)
    p2 = _pad_rows(p2, m_pad).astype(jnp.bfloat16)
    if has_proj:
        p_sc = _pad_rows(x_nhwc[:, ::stride, ::stride, :].reshape(M, cin),
                         m_pad).astype(jnp.bfloat16)
        (y2, y_sc), (s2, s_sc) = conv_stats_pallas(
            [(p2, prep["w2"]), (p_sc, prep["w_sc"])], m_pad, c_pad, tm)
        # ---- bn2 + bn_sc + add + relu, fused apply pass ----
        out2 = bn_apply_pallas([(y2, s2, prep["gb2"]),
                                (y_sc, s_sc, prep["gb_sc"])], None, True, M, tm)
    else:
        (y2,), (s2,) = conv_stats_pallas([(p2, prep["w2"])], m_pad, c_pad, tm)
        res = jnp.pad(x_nhwc.reshape(M, cin).astype(jnp.float32),
                      ((0, m_pad - M), (0, c_pad - cin)))
        out2 = bn_apply_pallas([(y2, s2, prep["gb2"])], res, True, M, tm)

    return out2[:M, :cout].reshape(N, Ho, Wo, cout)


# ----------------------------- pure-JAX reference --------------------------- #

def _ref_conv(x, w_oihw, stride, pad):
    w_hwio = jnp.transpose(w_oihw, (2, 3, 1, 0))
    return jax.lax.conv_general_dilated(
        x, w_hwio, window_strides=(stride, stride),
        padding=((pad, pad), (pad, pad)),
        dimension_numbers=("NHWC", "HWIO", "NHWC"),
        precision=jax.lax.Precision.HIGHEST)


def _ref_bn(y, g, b):
    mean = jnp.mean(y, axis=(0, 1, 2), keepdims=True)
    var = jnp.mean((y - mean) ** 2, axis=(0, 1, 2), keepdims=True)
    return (y - mean) * jax.lax.rsqrt(var + EPS) * g + b


def residual_block_ref(x, params, stride, round_conv_inputs=False):
    """Pure-JAX reference. round_conv_inputs=True rounds every conv operand to
    bf16 (exactly what the MXU sees) so the kernel checks to tight tolerance."""
    q = ((lambda a: a.astype(jnp.bfloat16).astype(jnp.float32))
         if round_conv_inputs else (lambda a: a))
    cin, cout = x.shape[-1], params["w1"].shape[0]
    if stride != 1 or cin != cout:
        r = _ref_bn(_ref_conv(q(x), q(params["w_sc"]), stride, 0),
                    params["g_sc"], params["b_sc"])
    else:
        r = x
    out = jax.nn.relu(_ref_bn(_ref_conv(q(x), q(params["w1"]), stride, 1),
                              params["g1"], params["b1"]))
    out = _ref_bn(_ref_conv(q(out), q(params["w2"]), 1, 1),
                  params["g2"], params["b2"])
    return jax.nn.relu(out + r)


# ------------------------------------ main ----------------------------------- #

def _make_params(key, cin, cout, with_proj):
    k1, k2, k3 = jax.random.split(key, 3)
    params = {
        "w1": 0.1 * jax.random.normal(k1, (cout, cin, 3, 3), jnp.float32),
        "w2": 0.1 * jax.random.normal(k2, (cout, cout, 3, 3), jnp.float32),
        "g1": jnp.ones((cout,), jnp.float32), "b1": jnp.zeros((cout,), jnp.float32),
        "g2": jnp.ones((cout,), jnp.float32), "b2": jnp.zeros((cout,), jnp.float32),
    }
    if with_proj:
        params["w_sc"] = 0.1 * jax.random.normal(k3, (cout, cin, 1, 1), jnp.float32)
        params["g_sc"] = jnp.ones((cout,), jnp.float32)
        params["b_sc"] = jnp.zeros((cout,), jnp.float32)
    return params


def _run_case(key, n, cin, cout, h, w, stride, tm):
    kx, kp = jax.random.split(key)
    x = jax.random.normal(kx, (n, h, w, cin), jnp.float32)   # NHWC layout
    with_proj = (stride != 1) or (cin != cout)
    params = _make_params(kp, cin, cout, with_proj)
    prep = prepare_params(params, cout)

    fwd = jax.jit(functools.partial(residual_block_forward,
                                    stride=stride, cout=cout, tm=tm))
    out = jax.block_until_ready(fwd(x, prep))

    ho, wo = (h - 1) // stride + 1, (w - 1) // stride + 1
    assert out.shape == (n, ho, wo, cout), out.shape

    # Tight check: reference fed the same bf16-rounded conv operands as the MXU.
    ref_bf16 = residual_block_ref(x, params, stride, round_conv_inputs=True)
    err_t = float(jnp.max(jnp.abs(out - ref_bf16)))
    assert err_t < 1e-2, f"tight (bf16-operand) check failed: max abs err {err_t}"

    # Loose check vs. full-f32 reference (difference = bf16 MXU operand rounding).
    ref_f32 = residual_block_ref(x, params, stride, round_conv_inputs=False)
    err_l = float(jnp.max(jnp.abs(out - ref_f32)))
    assert err_l < 6e-2, f"f32-reference check failed: max abs err {err_l}"


if __name__ == "__main__":
    key = jax.random.PRNGKey(0)
    k1, k2 = jax.random.split(key)
    # Projection shortcut (stride 2, channel change); tm=64 -> multi-tile grid
    # so the cross-tile BN sum/sumsq accumulation path is exercised.
    _run_case(k1, n=2, cin=4, cout=8, h=16, w=16, stride=2, tm=64)
    # Identity shortcut (stride 1, same channels).
    _run_case(k2, n=2, cin=8, cout=8, h=8, w=8, stride=1, tm=64)
    print("KERNEL_OK")
</pallas_src>

<mosaic_0001>
module attributes {stable_mosaic.version = 11 : i64} {
  func.func @kernel(%arg0: i32, %arg1: memref<64x128xf32, #tpu.memory_space<vmem>>, %arg2: memref<2x128xf32, #tpu.memory_space<vmem>>, %arg3: memref<2x128xf32, #tpu.memory_space<vmem>>, %arg4: memref<64x128xf32, #tpu.memory_space<vmem>>) attributes {dimension_semantics = [#tpu.dimension_semantics<parallel>], iteration_bounds = array<i64: 2>, scalar_prefetch = 0 : i64, scratch_operands = 0 : i64, tpu.core_type = #tpu.core_type<tc>, window_params = [{transform_indices = @transform_0, window_bounds = array<i64: 64, 128>}, {pipeline_mode = #tpu.pipeline_mode<synchronous>, transform_indices = @transform_1, window_bounds = array<i64: 2, 128>}, {pipeline_mode = #tpu.pipeline_mode<synchronous>, transform_indices = @transform_2, window_bounds = array<i64: 2, 128>}, {transform_indices = @transform_3, window_bounds = array<i64: 64, 128>}]} {
    %c0 = arith.constant 0 : index
    %c0_0 = arith.constant 0 : index
    %0 = vector.load %arg2[%c0, %c0_0] : memref<2x128xf32, #tpu.memory_space<vmem>>, vector<2x128xf32>
    %c0_1 = arith.constant 0 : index
    %c0_2 = arith.constant 0 : index
    %1 = vector.load %arg3[%c0_1, %c0_2] : memref<2x128xf32, #tpu.memory_space<vmem>>, vector<2x128xf32>
    %2 = vector.extract_strided_slice %0 {offsets = [0, 0], sizes = [1, 128], strides = [1, 1]} : vector<2x128xf32> to vector<1x128xf32>
    %cst = arith.constant 7.812500e-03 : f32
    %3 = vector.broadcast %cst : f32 to vector<1x128xf32>
    %4 = arith.mulf %2, %3 : vector<1x128xf32>
    %5 = vector.extract_strided_slice %0 {offsets = [1, 0], sizes = [1, 128], strides = [1, 1]} : vector<2x128xf32> to vector<1x128xf32>
    %cst_3 = arith.constant 7.812500e-03 : f32
    %6 = vector.broadcast %cst_3 : f32 to vector<1x128xf32>
    %7 = arith.mulf %5, %6 : vector<1x128xf32>
    %8 = arith.mulf %4, %4 : vector<1x128xf32>
    %9 = arith.subf %7, %8 : vector<1x128xf32>
    %cst_4 = arith.constant 0.000000e+00 : f32
    %10 = vector.broadcast %cst_4 : f32 to vector<1x128xf32>
    %11 = arith.maximumf %9, %10 : vector<1x128xf32>
    %cst_5 = arith.constant 9.99999974E-6 : f32
    %12 = vector.broadcast %cst_5 : f32 to vector<1x128xf32>
    %13 = arith.addf %11, %12 : vector<1x128xf32>
    %14 = math.rsqrt %13 : vector<1x128xf32>
    %15 = vector.extract_strided_slice %1 {offsets = [0, 0], sizes = [1, 128], strides = [1, 1]} : vector<2x128xf32> to vector<1x128xf32>
    %16 = arith.mulf %14, %15 : vector<1x128xf32>
    %c0_6 = arith.constant 0 : index
    %c0_7 = arith.constant 0 : index
    %17 = vector.load %arg1[%c0_6, %c0_7] : memref<64x128xf32, #tpu.memory_space<vmem>>, vector<64x128xf32>
    %18 = vector.broadcast %4 : vector<1x128xf32> to vector<64x128xf32>
    %19 = arith.subf %17, %18 : vector<64x128xf32>
    %20 = vector.broadcast %16 : vector<1x128xf32> to vector<64x128xf32>
    %21 = arith.mulf %19, %20 : vector<64x128xf32>
    %22 = vector.extract_strided_slice %1 {offsets = [1, 0], sizes = [1, 128], strides = [1, 1]} : vector<2x128xf32> to vector<1x128xf32>
    %23 = vector.broadcast %22 : vector<1x128xf32> to vector<64x128xf32>
    %24 = arith.addf %21, %23 : vector<64x128xf32>
    %cst_8 = arith.constant 0.000000e+00 : f32
    %25 = vector.broadcast %cst_8 : f32 to vector<64x128xf32>
    %26 = arith.maximumf %24, %25 : vector<64x128xf32>
    %c0_9 = arith.constant 0 : index
    %c0_10 = arith.constant 0 : index
    %27 = vector.load %arg4[%c0_9, %c0_10] : memref<64x128xf32, #tpu.memory_space<vmem>>, vector<64x128xf32>
    tpu.vector_store %arg4[%c0_9, %c0_10], %26 {strides = array<i32>} : memref<64x128xf32, #tpu.memory_space<vmem>>, vector<64x128xf32>,
    return
  }
  func.func @transform_0(%arg0: i32) -> (i32, i32) {
    %c0_i32 = arith.constant 0 : i32
    %c0_i32_0 = arith.constant 0 : i32
    return %arg0, %c0_i32 : i32, i32
  }
  func.func @transform_1(%arg0: i32) -> (i32, i32) {
    %c0_i32 = arith.constant 0 : i32
    %c0_i32_0 = arith.constant 0 : i32
    %c0_i32_1 = arith.constant 0 : i32
    return %c0_i32, %c0_i32_0 : i32, i32
  }
  func.func @transform_2(%arg0: i32) -> (i32, i32) {
    %c0_i32 = arith.constant 0 : i32
    %c0_i32_0 = arith.constant 0 : i32
    %c0_i32_1 = arith.constant 0 : i32
    return %c0_i32, %c0_i32_0 : i32, i32
  }
  func.func @transform_3(%arg0: i32) -> (i32, i32) {
    %c0_i32 = arith.constant 0 : i32
    %c0_i32_0 = arith.constant 0 : i32
    return %arg0, %c0_i32 : i32, i32
  }
}

module attributes {stable_mosaic.version = 11 : i64} {
  func.func @kernel(%arg0: i32, %arg1: memref<64x36xbf16, #tpu.memory_space<vmem>>, %arg2: memref<36x128xbf16, #tpu.memory_space<vmem>>, %arg3: memref<64x128xf32, #tpu.memory_space<vmem>>, %arg4: memref<2x128xf32, #tpu.memory_space<vmem>>) attributes {dimension_semantics = [#tpu.dimension_semantics<arbitrary>], iteration_bounds = array<i64: 2>, scalar_prefetch = 0 : i64, scratch_operands = 0 : i64, tpu.core_type = #tpu.core_type<tc>, window_params = [{transform_indices = @transform_0, window_bounds = array<i64: 64, 36>}, {pipeline_mode = #tpu.pipeline_mode<synchronous>, transform_indices = @transform_1, window_bounds = array<i64: 36, 128>}, {transform_indices = @transform_2, window_bounds = array<i64: 64, 128>}, {pipeline_mode = #tpu.pipeline_mode<synchronous>, transform_indices = @transform_3, window_bounds = array<i64: 2, 128>}]} {
    %c0_i32 = arith.constant 0 : i32
    %0 = arith.cmpi eq, %arg0, %c0_i32 : i32
    %1 = arith.extui %0 : i1 to i32
    %c0_i32_0 = arith.constant 0 : i32
    %2 = arith.cmpi ne, %1, %c0_i32_0 : i32
    scf.if %2 {
      %cst_12 = arith.constant 0.000000e+00 : f32
      %16 = vector.broadcast %cst_12 : f32 to vector<2x128xf32>
      %c0_13 = arith.constant 0 : index
      %c0_14 = arith.constant 0 : index
      %17 = vector.load %arg4[%c0_13, %c0_14] : memref<2x128xf32, #tpu.memory_space<vmem>>, vector<2x128xf32>
      tpu.vector_store %arg4[%c0_13, %c0_14], %16 {strides = array<i32>} : memref<2x128xf32, #tpu.memory_space<vmem>>, vector<2x128xf32>,
    } else {
    }
    %c0 = arith.constant 0 : index
    %c0_1 = arith.constant 0 : index
    %3 = vector.load %arg1[%c0, %c0_1] : memref<64x36xbf16, #tpu.memory_space<vmem>>, vector<64x36xbf16>
    %c0_2 = arith.constant 0 : index
    %c0_3 = arith.constant 0 : index
    %4 = vector.load %arg2[%c0_2, %c0_3] : memref<36x128xbf16, #tpu.memory_space<vmem>>, vector<36x128xbf16>
    %cst = arith.constant dense<0.000000e+00> : vector<64x128xf32>
    %5 = tpu.matmul %3, %4, %cst {dimension_numbers = #tpu.dot_dimension_numbers<[1], [0], [0], [1], [0, 0, 1, 1], [], []>} : vector<64x36xbf16>, vector<36x128xbf16>, vector<64x128xf32> -> vector<64x128xf32>
    %c0_4 = arith.constant 0 : index
    %c0_5 = arith.constant 0 : index
    %6 = vector.load %arg3[%c0_4, %c0_5] : memref<64x128xf32, #tpu.memory_space<vmem>>, vector<64x128xf32>
    tpu.vector_store %arg3[%c0_4, %c0_5], %5 {strides = array<i32>} : memref<64x128xf32, #tpu.memory_space<vmem>>, vector<64x128xf32>,
    %c0_6 = arith.constant 0 : index
    %c0_7 = arith.constant 0 : index
    %7 = vector.load %arg4[%c0_6, %c0_7] : memref<2x128xf32, #tpu.memory_space<vmem>>, vector<2x128xf32>
    %cst_8 = arith.constant dense<0.000000e+00> : vector<128xf32>
    %8 = vector.multi_reduction <add>, %5, %cst_8 [0] : vector<64x128xf32> to vector<128xf32>
    %9 = vector.shape_cast %8 : vector<128xf32> to vector<1x128xf32>
    %10 = arith.mulf %5, %5 : vector<64x128xf32>
    %cst_9 = arith.constant dense<0.000000e+00> : vector<128xf32>
    %11 = vector.multi_reduction <add>, %10, %cst_9 [0] : vector<64x128xf32> to vector<128xf32>
    %12 = vector.shape_cast %11 : vector<128xf32> to vector<1x128xf32>
    %13 = tpu.concatenate %9, %12 in 0 : vector<1x128xf32>, vector<1x128xf32> -> vector<2x128xf32>
    %14 = arith.addf %7, %13 : vector<2x128xf32>
    %c0_10 = arith.constant 0 : index
    %c0_11 = arith.constant 0 : index
    %15 = vector.load %arg4[%c0_10, %c0_11] : memref<2x128xf32, #tpu.memory_space<vmem>>, vector<2x128xf32>
    tpu.vector_store %arg4[%c0_10, %c0_11], %14 {strides = array<i32>} : memref<2x128xf32, #tpu.memory_space<vmem>>, vector<2x128xf32>,
    return
  }
  func.func @transform_0(%arg0: i32) -> (i32, i32) {
    %c0_i32 = arith.constant 0 : i32
    %c0_i32_0 = arith.constant 0 : i32
    return %arg0, %c0_i32 : i32, i32
  }
  func.func @transform_1(%arg0: i32) -> (i32, i32) {
    %c0_i32 = arith.constant 0 : i32
    %c0_i32_0 = arith.constant 0 : i32
    %c0_i32_1 = arith.constant 0 : i32
    return %c0_i32, %c0_i32_0 : i32, i32
  }
  func.func @transform_2(%arg0: i32) -> (i32, i32) {
    %c0_i32 = arith.constant 0 : i32
    %c0_i32_0 = arith.constant 0 : i32
    return %arg0, %c0_i32 : i32, i32
  }
  func.func @transform_3(%arg0: i32) -> (i32, i32) {
    %c0_i32 = arith.constant 0 : i32
    %c0_i32_0 = arith.constant 0 : i32
    %c0_i32_1 = arith.constant 0 : i32
    return %c0_i32, %c0_i32_0 : i32, i32
  }
}

module attributes {stable_mosaic.version = 11 : i64} {
  func.func @kernel(%arg0: i32, %arg1: memref<64x72xbf16, #tpu.memory_space<vmem>>, %arg2: memref<72x128xbf16, #tpu.memory_space<vmem>>, %arg3: memref<64x4xbf16, #tpu.memory_space<vmem>>, %arg4: memref<4x128xbf16, #tpu.memory_space<vmem>>, %arg5: memref<64x128xf32, #tpu.memory_space<vmem>>, %arg6: memref<64x128xf32, #tpu.memory_space<vmem>>, %arg7: memref<2x128xf32, #tpu.memory_space<vmem>>, %arg8: memref<2x128xf32, #tpu.memory_space<vmem>>) attributes {dimension_semantics = [#tpu.dimension_semantics<arbitrary>], iteration_bounds = array<i64: 2>, scalar_prefetch = 0 : i64, scratch_operands = 0 : i64, tpu.core_type = #tpu.core_type<tc>, window_params = [{transform_indices = @transform_0, window_bounds = array<i64: 64, 72>}, {pipeline_mode = #tpu.pipeline_mode<synchronous>, transform_indices = @transform_1, window_bounds = array<i64: 72, 128>}, {transform_indices = @transform_2, window_bounds = array<i64: 64, 4>}, {pipeline_mode = #tpu.pipeline_mode<synchronous>, transform_indices = @transform_3, window_bounds = array<i64: 4, 128>}, {transform_indices = @transform_4, window_bounds = array<i64: 64, 128>}, {transform_indices = @transform_5, window_bounds = array<i64: 64, 128>}, {pipeline_mode = #tpu.pipeline_mode<synchronous>, transform_indices = @transform_6, window_bounds = array<i64: 2, 128>}, {pipeline_mode = #tpu.pipeline_mode<synchronous>, transform_indices = @transform_7, window_bounds = array<i64: 2, 128>}]} {
    %c0_i32 = arith.constant 0 : i32
    %0 = arith.cmpi eq, %arg0, %c0_i32 : i32
    %1 = arith.extui %0 : i1 to i32
    %c0_i32_0 = arith.constant 0 : i32
    %2 = arith.cmpi ne, %1, %c0_i32_0 : i32
    scf.if %2 {
      %cst_25 = arith.constant 0.000000e+00 : f32
      %29 = vector.broadcast %cst_25 : f32 to vector<2x128xf32>
      %c0_26 = arith.constant 0 : index
      %c0_27 = arith.constant 0 : index
      %30 = vector.load %arg7[%c0_26, %c0_27] : memref<2x128xf32, #tpu.memory_space<vmem>>, vector<2x128xf32>
      tpu.vector_store %arg7[%c0_26, %c0_27], %29 {strides = array<i32>} : memref<2x128xf32, #tpu.memory_space<vmem>>, vector<2x128xf32>,
      %cst_28 = arith.constant 0.000000e+00 : f32
      %31 = vector.broadcast %cst_28 : f32 to vector<2x128xf32>
      %c0_29 = arith.constant 0 : index
      %c0_30 = arith.constant 0 : index
      %32 = vector.load %arg8[%c0_29, %c0_30] : memref<2x128xf32, #tpu.memory_space<vmem>>, vector<2x128xf32>
      tpu.vector_store %arg8[%c0_29, %c0_30], %31 {strides = array<i32>} : memref<2x128xf32, #tpu.memory_space<vmem>>, vector<2x128xf32>,
    } else {
    }
    %c0 = arith.constant 0 : index
    %c0_1 = arith.constant 0 : index
    %3 = vector.load %arg1[%c0, %c0_1] : memref<64x72xbf16, #tpu.memory_space<vmem>>, vector<64x72xbf16>
    %c0_2 = arith.constant 0 : index
    %c0_3 = arith.constant 0 : index
    %4 = vector.load %arg2[%c0_2, %c0_3] : memref<72x128xbf16, #tpu.memory_space<vmem>>, vector<72x128xbf16>
    %cst = arith.constant dense<0.000000e+00> : vector<64x128xf32>
    %5 = tpu.matmul %3, %4, %cst {dimension_numbers = #tpu.dot_dimension_numbers<[1], [0], [0], [1], [0, 0, 1, 1], [], []>} : vector<64x72xbf16>, vector<72x128xbf16>, vector<64x128xf32> -> vector<64x128xf32>
    %c0_4 = arith.constant 0 : index
    %c0_5 = arith.constant 0 : index
    %6 = vector.load %arg5[%c0_4, %c0_5] : memref<64x128xf32, #tpu.memory_space<vmem>>, vector<64x128xf32>
    tpu.vector_store %arg5[%c0_4, %c0_5], %5 {strides = array<i32>} : memref<64x128xf32, #tpu.memory_space<vmem>>, vector<64x128xf32>,
    %c0_6 = arith.constant 0 : index
    %c0_7 = arith.constant 0 : index
    %7 = vector.load %arg7[%c0_6, %c0_7] : memref<2x128xf32, #tpu.memory_space<vmem>>, vector<2x128xf32>
    %cst_8 = arith.constant dense<0.000000e+00> : vector<128xf32>
    %8 = vector.multi_reduction <add>, %5, %cst_8 [0] : vector<64x128xf32> to vector<128xf32>
    %9 = vector.shape_cast %8 : vector<128xf32> to vector<1x128xf32>
    %10 = arith.mulf %5, %5 : vector<64x128xf32>
    %cst_9 = arith.constant dense<0.000000e+00> : vector<128xf32>
    %11 = vector.multi_reduction <add>, %10, %cst_9 [0] : vector<64x128xf32> to vector<128xf32>
    %12 = vector.shape_cast %11 : vector<128xf32> to vector<1x128xf32>
    %13 = tpu.concatenate %9, %12 in 0 : vector<1x128xf32>, vector<1x128xf32> -> vector<2x128xf32>
    %14 = arith.addf %7, %13 : vector<2x128xf32>
    %c0_10 = arith.constant 0 : index
    %c0_11 = arith.constant 0 : index
    %15 = vector.load %arg7[%c0_10, %c0_11] : memref<2x128xf32, #tpu.memory_space<vmem>>, vector<2x128xf32>
    tpu.vector_store %arg7[%c0_10, %c0_11], %14 {strides = array<i32>} : memref<2x128xf32, #tpu.memory_space<vmem>>, vector<2x128xf32>,
    %c0_12 = arith.constant 0 : index
    %c0_13 = arith.constant 0 : index
    %16 = vector.load %arg3[%c0_12, %c0_13] : memref<64x4xbf16, #tpu.memory_space<vmem>>, vector<64x4xbf16>
    %c0_14 = arith.constant 0 : index
    %c0_15 = arith.constant 0 : index
    %17 = vector.load %arg4[%c0_14, %c0_15] : memref<4x128xbf16, #tpu.memory_space<vmem>>, vector<4x128xbf16>
    %cst_16 = arith.constant dense<0.000000e+00> : vector<64x128xf32>
    %18 = tpu.matmul %16, %17, %cst_16 {dimension_numbers = #tpu.dot_dimension_numbers<[1], [0], [0], [1], [0, 0, 1, 1], [], []>} : vector<64x4xbf16>, vector<4x128xbf16>, vector<64x128xf32> -> vector<64x128xf32>
    %c0_17 = arith.constant 0 : index
    %c0_18 = arith.constant 0 : index
    %19 = vector.load %arg6[%c0_17, %c0_18] : memref<64x128xf32, #tpu.memory_space<vmem>>, vector<64x128xf32>
    tpu.vector_store %arg6[%c0_17, %c0_18], %18 {strides = array<i32>} : memref<64x128xf32, #tpu.memory_space<vmem>>, vector<64x128xf32>,
    %c0_19 = arith.constant 0 : index
    %c0_20 = arith.constant 0 : index
    %20 = vector.load %arg8[%c0_19, %c0_20] : memref<2x128xf32, #tpu.memory_space<vmem>>, vector<2x128xf32>
    %cst_21 = arith.constant dense<0.000000e+00> : vector<128xf32>
    %21 = vector.multi_reduction <add>, %18, %cst_21 [0] : vector<64x128xf32> to vector<128xf32>
    %22 = vector.shape_cast %21 : vector<128xf32> to vector<1x128xf32>
    %23 = arith.mulf %18, %18 : vector<64x128xf32>
    %cst_22 = arith.constant dense<0.000000e+00> : vector<128xf32>
    %24 = vector.multi_reduction <add>, %23, %cst_22 [0] : vector<64x128xf32> to vector<128xf32>
    %25 = vector.shape_cast %24 : vector<128xf32> to vector<1x128xf32>
    %26 = tpu.concatenate %22, %25 in 0 : vector<1x128xf32>, vector<1x128xf32> -> vector<2x128xf32>
    %27 = arith.addf %20, %26 : vector<2x128xf32>
    %c0_23 = arith.constant 0 : index
    %c0_24 = arith.constant 0 : index
    %28 = vector.load %arg8[%c0_23, %c0_24] : memref<2x128xf32, #tpu.memory_space<vmem>>, vector<2x128xf32>
    tpu.vector_store %arg8[%c0_23, %c0_24], %27 {strides = array<i32>} : memref<2x128xf32, #tpu.memory_space<vmem>>, vector<2x128xf32>,
    return
  }
  func.func @transform_0(%arg0: i32) -> (i32, i32) {
    %c0_i32 = arith.constant 0 : i32
    %c0_i32_0 = arith.constant 0 : i32
    return %arg0, %c0_i32 : i32, i32
  }
  func.func @transform_1(%arg0: i32) -> (i32, i32) {
    %c0_i32 = arith.constant 0 : i32
    %c0_i32_0 = arith.constant 0 : i32
    %c0_i32_1 = arith.constant 0 : i32
    return %c0_i32, %c0_i32_0 : i32, i32
  }
  func.func @transform_2(%arg0: i32) -> (i32, i32) {
    %c0_i32 = arith.constant 0 : i32
    %c0_i32_0 = arith.constant 0 : i32
    return %arg0, %c0_i32 : i32, i32
  }
  func.func @transform_3(%arg0: i32) -> (i32, i32) {
    %c0_i32 = arith.constant 0 : i32
    %c0_i32_0 = arith.constant 0 : i32
    %c0_i32_1 = arith.constant 0 : i32
    return %c0_i32, %c0_i32_0 : i32, i32
  }
  func.func @transform_4(%arg0: i32) -> (i32, i32) {
    %c0_i32 = arith.constant 0 : i32
    %c0_i32_0 = arith.constant 0 : i32
    return %arg0, %c0_i32 : i32, i32
  }
  func.func @transform_5(%arg0: i32) -> (i32, i32) {
    %c0_i32 = arith.constant 0 : i32
    %c0_i32_0 = arith.constant 0 : i32
    return %arg0, %c0_i32 : i32, i32
  }
  func.func @transform_6(%arg0: i32) -> (i32, i32) {
    %c0_i32 = arith.constant 0 : i32
    %c0_i32_0 = arith.constant 0 : i32
    %c0_i32_1 = arith.constant 0 : i32
    return %c0_i32, %c0_i32_0 : i32, i32
  }
  func.func @transform_7(%arg0: i32) -> (i32, i32) {
    %c0_i32 = arith.constant 0 : i32
    %c0_i32_0 = arith.constant 0 : i32
    %c0_i32_1 = arith.constant 0 : i32
    return %c0_i32, %c0_i32_0 : i32, i32
  }
}

module attributes {stable_mosaic.version = 11 : i64} {
  func.func @kernel(%arg0: i32, %arg1: memref<64x128xf32, #tpu.memory_space<vmem>>, %arg2: memref<2x128xf32, #tpu.memory_space<vmem>>, %arg3: memref<2x128xf32, #tpu.memory_space<vmem>>, %arg4: memref<64x128xf32, #tpu.memory_space<vmem>>, %arg5: memref<2x128xf32, #tpu.memory_space<vmem>>, %arg6: memref<2x128xf32, #tpu.memory_space<vmem>>, %arg7: memref<64x128xf32, #tpu.memory_space<vmem>>) attributes {dimension_semantics = [#tpu.dimension_semantics<parallel>], iteration_bounds = array<i64: 2>, scalar_prefetch = 0 : i64, scratch_operands = 0 : i64, tpu.core_type = #tpu.core_type<tc>, window_params = [{transform_indices = @transform_0, window_bounds = array<i64: 64, 128>}, {pipeline_mode = #tpu.pipeline_mode<synchronous>, transform_indices = @transform_1, window_bounds = array<i64: 2, 128>}, {pipeline_mode = #tpu.pipeline_mode<synchronous>, transform_indices = @transform_2, window_bounds = array<i64: 2, 128>}, {transform_indices = @transform_3, window_bounds = array<i64: 64, 128>}, {pipeline_mode = #tpu.pipeline_mode<synchronous>, transform_indices = @transform_4, window_bounds = array<i64: 2, 128>}, {pipeline_mode = #tpu.pipeline_mode<synchronous>, transform_indices = @transform_5, window_bounds = array<i64: 2, 128>}, {transform_indices = @transform_6, window_bounds = array<i64: 64, 128>}]} {
    %c0 = arith.constant 0 : index
    %c0_0 = arith.constant 0 : index
    %0 = vector.load %arg2[%c0, %c0_0] : memref<2x128xf32, #tpu.memory_space<vmem>>, vector<2x128xf32>
    %c0_1 = arith.constant 0 : index
    %c0_2 = arith.constant 0 : index
    %1 = vector.load %arg3[%c0_1, %c0_2] : memref<2x128xf32, #tpu.memory_space<vmem>>, vector<2x128xf32>
    %2 = vector.extract_strided_slice %0 {offsets = [0, 0], sizes = [1, 128], strides = [1, 1]} : vector<2x128xf32> to vector<1x128xf32>
    %cst = arith.constant 7.812500e-03 : f32
    %3 = vector.broadcast %cst : f32 to vector<1x128xf32>
    %4 = arith.mulf %2, %3 : vector<1x128xf32>
    %5 = vector.extract_strided_slice %0 {offsets = [1, 0], sizes = [1, 128], strides = [1, 1]} : vector<2x128xf32> to vector<1x128xf32>
    %cst_3 = arith.constant 7.812500e-03 : f32
    %6 = vector.broadcast %cst_3 : f32 to vector<1x128xf32>
    %7 = arith.mulf %5, %6 : vector<1x128xf32>
    %8 = arith.mulf %4, %4 : vector<1x128xf32>
    %9 = arith.subf %7, %8 : vector<1x128xf32>
    %cst_4 = arith.constant 0.000000e+00 : f32
    %10 = vector.broadcast %cst_4 : f32 to vector<1x128xf32>
    %11 = arith.maximumf %9, %10 : vector<1x128xf32>
    %cst_5 = arith.constant 9.99999974E-6 : f32
    %12 = vector.broadcast %cst_5 : f32 to vector<1x128xf32>
    %13 = arith.addf %11, %12 : vector<1x128xf32>
    %14 = math.rsqrt %13 : vector<1x128xf32>
    %15 = vector.extract_strided_slice %1 {offsets = [0, 0], sizes = [1, 128], strides = [1, 1]} : vector<2x128xf32> to vector<1x128xf32>
    %16 = arith.mulf %14, %15 : vector<1x128xf32>
    %c0_6 = arith.constant 0 : index
    %c0_7 = arith.constant 0 : index
    %17 = vector.load %arg1[%c0_6, %c0_7] : memref<64x128xf32, #tpu.memory_space<vmem>>, vector<64x128xf32>
    %18 = vector.broadcast %4 : vector<1x128xf32> to vector<64x128xf32>
    %19 = arith.subf %17, %18 : vector<64x128xf32>
    %20 = vector.broadcast %16 : vector<1x128xf32> to vector<64x128xf32>
    %21 = arith.mulf %19, %20 : vector<64x128xf32>
    %22 = vector.extract_strided_slice %1 {offsets = [1, 0], sizes = [1, 128], strides = [1, 1]} : vector<2x128xf32> to vector<1x128xf32>
    %23 = vector.broadcast %22 : vector<1x128xf32> to vector<64x128xf32>
    %24 = arith.addf %21, %23 : vector<64x128xf32>
    %c0_8 = arith.constant 0 : index
    %c0_9 = arith.constant 0 : index
    %25 = vector.load %arg5[%c0_8, %c0_9] : memref<2x128xf32, #tpu.memory_space<vmem>>, vector<2x128xf32>
    %c0_10 = arith.constant 0 : index
    %c0_11 = arith.constant 0 : index
    %26 = vector.load %arg6[%c0_10, %c0_11] : memref<2x128xf32, #tpu.memory_space<vmem>>, vector<2x128xf32>
    %27 = vector.extract_strided_slice %25 {offsets = [0, 0], sizes = [1, 128], strides = [1, 1]} : vector<2x128xf32> to vector<1x128xf32>
    %cst_12 = arith.constant 7.812500e-03 : f32
    %28 = vector.broadcast %cst_12 : f32 to vector<1x128xf32>
    %29 = arith.mulf %27, %28 : vector<1x128xf32>
    %30 = vector.extract_strided_slice %25 {offsets = [1, 0], sizes = [1, 128], strides = [1, 1]} : vector<2x128xf32> to vector<1x128xf32>
    %cst_13 = arith.constant 7.812500e-03 : f32
    %31 = vector.broadcast %cst_13 : f32 to vector<1x128xf32>
    %32 = arith.mulf %30, %31 : vector<1x128xf32>
    %33 = arith.mulf %29, %29 : vector<1x128xf32>
    %34 = arith.subf %32, %33 : vector<1x128xf32>
    %cst_14 = arith.constant 0.000000e+00 : f32
    %35 = vector.broadcast %cst_14 : f32 to vector<1x128xf32>
    %36 = arith.maximumf %34, %35 : vector<1x128xf32>
    %cst_15 = arith.constant 9.99999974E-6 : f32
    %37 = vector.broadcast %cst_15 : f32 to vector<1x128xf32>
    %38 = arith.addf %36, %37 : vector<1x128xf32>
    %39 = math.rsqrt %38 : vector<1x128xf32>
    %40 = vector.extract_strided_slice %26 {offsets = [0, 0], sizes = [1, 128], strides = [1, 1]} : vector<2x128xf32> to vector<1x128xf32>
    %41 = arith.mulf %39, %40 : vector<1x128xf32>
    %c0_16 = arith.constant 0 : index
    %c0_17 = arith.constant 0 : index
    %42 = vector.load %arg4[%c0_16, %c0_17] : memref<64x128xf32, #tpu.memory_space<vmem>>, vector<64x128xf32>
    %43 = vector.broadcast %29 : vector<1x128xf32> to vector<64x128xf32>
    %44 = arith.subf %42, %43 : vector<64x128xf32>
    %45 = vector.broadcast %41 : vector<1x128xf32> to vector<64x128xf32>
    %46 = arith.mulf %44, %45 : vector<64x128xf32>
    %47 = vector.extract_strided_slice %26 {offsets = [1, 0], sizes = [1, 128], strides = [1, 1]} : vector<2x128xf32> to vector<1x128xf32>
    %48 = vector.broadcast %47 : vector<1x128xf32> to vector<64x128xf32>
    %49 = arith.addf %46, %48 : vector<64x128xf32>
    %50 = arith.addf %24, %49 : vector<64x128xf32>
    %cst_18 = arith.constant 0.000000e+00 : f32
    %51 = vector.broadcast %cst_18 : f32 to vector<64x128xf32>
    %52 = arith.maximumf %50, %51 : vector<64x128xf32>
    %c0_19 = arith.constant 0 : index
    %c0_20 = arith.constant 0 : index
    %53 = vector.load %arg7[%c0_19, %c0_20] : memref<64x128xf32, #tpu.memory_space<vmem>>, vector<64x128xf32>
    tpu.vector_store %arg7[%c0_19, %c0_20], %52 {strides = array<i32>} : memref<64x128xf32, #tpu.memory_space<vmem>>, vector<64x128xf32>,
    return
  }
  func.func @transform_0(%arg0: i32) -> (i32, i32) {
    %c0_i32 = arith.constant 0 : i32
    %c0_i32_0 = arith.constant 0 : i32
    return %arg0, %c0_i32 : i32, i32
  }
  func.func @transform_1(%arg0: i32) -> (i32, i32) {
    %c0_i32 = arith.constant 0 : i32
    %c0_i32_0 = arith.constant 0 : i32
    %c0_i32_1 = arith.constant 0 : i32
    return %c0_i32, %c0_i32_0 : i32, i32
  }
  func.func @transform_2(%arg0: i32) -> (i32, i32) {
    %c0_i32 = arith.constant 0 : i32
    %c0_i32_0 = arith.constant 0 : i32
    %c0_i32_1 = arith.constant 0 : i32
    return %c0_i32, %c0_i32_0 : i32, i32
  }
  func.func @transform_3(%arg0: i32) -> (i32, i32) {
    %c0_i32 = arith.constant 0 : i32
    %c0_i32_0 = arith.constant 0 : i32
    return %arg0, %c0_i32 : i32, i32
  }
  func.func @transform_4(%arg0: i32) -> (i32, i32) {
    %c0_i32 = arith.constant 0 : i32
    %c0_i32_0 = arith.constant 0 : i32
    %c0_i32_1 = arith.constant 0 : i32
    return %c0_i32, %c0_i32_0 : i32, i32
  }
  func.func @transform_5(%arg0: i32) -> (i32, i32) {
    %c0_i32 = arith.constant 0 : i32
    %c0_i32_0 = arith.constant 0 : i32
    %c0_i32_1 = arith.constant 0 : i32
    return %c0_i32, %c0_i32_0 : i32, i32
  }
  func.func @transform_6(%arg0: i32) -> (i32, i32) {
    %c0_i32 = arith.constant 0 : i32
    %c0_i32_0 = arith.constant 0 : i32
    return %arg0, %c0_i32 : i32, i32
  }
}

</mosaic_0001>

<bundles_post_ra>
// kernel: residual_block_forward.5
= control target key start
LH: loop header
LB: loop body
LE: loop exit
PB: predicated region body
PF: predicated region fallthrough
CT: control target
= control target key end

     0   :  { %s354_s12 = smov 0   ;;  %s384_s0 = inlined_call_operand.vmem [shape: f32[128,128], index: 0, kind: input, shape index: {}]   ;;  %s385_s1 = inlined_call_operand.vmem [shape: f32[2,128], index: 1, kind: input, shape index: {}]   ;;  %s386_s2 = inlined_call_operand.vmem [shape: f32[2,128], index: 2, kind: input, shape index: {}]   ;;  %s387_s3 = inlined_call_operand.vmem [shape: f32[128,128], index: 3, kind: output, shape index: {}]  }
   0x1 LB: > { %s305_s13 = sadd.s32 4294967295, %s332_s12   ;;  %p309_p0 = scmp.ge.s32.totalorder %s332_s12, 1  ;;  %s332_s12 = sphi %s354_s12, %s13_s12  }
   0x2   : > { %p138_p1 = scmp.lt.s32.totalorder %s332_s12, 3 }
   0x4   : > { %p139_p2 = pnand %p309_p0, %p138_p1 }
   0x5   : > { %v174_v0 = vld [vmem:[%s385_s1] sm:$0x3] (!%p139_p2)  ;;  %s310_s16 = sshll.u32 (!%p139_p2), %s305_s13, 3  ;;  %v197_v5 = vlaneseq (!%p139_p2) }
   0x6   : > { %142 = sbr.rel (%p139_p2) target bundleno = 43 (0x2b), region = 32  ;;  %v176_v1 = vmul.f32 (!%p139_p2), 0.0078125, %v174_v0  ;;  %p163_p3 = scmp.lt.s32.totalorder (!%p139_p2), %s310_s16, 15  ;;  %v175_v10 = vld [vmem:[%s386_s2] sm:$0x3] (!%p139_p2) }
   0x7   : > { %v198_v8 = vshrl.u32 (!%p139_p2), %v197_v5, 7  ;;  %v186_v12 = vrot.slane (!%p139_p2), %v175_v10, 7 }
   0x8   : > { %v177_v2 = vmul.f32 (!%p139_p2), %v176_v1, %v176_v1 }
   0x9   : > { %v199_v9 = vsub.s32 (!%p139_p2), 0, %v198_v8  ;;  %v211_v18 = vsub.s32 (!%p139_p2), 1, %v198_v8 }
   0xa   : > { %v179_v3 = vrot.slane (!%p139_p2), %v177_v2, 7 }
   0xb   : > { %v200_v11 = vrot.slane (!%p139_p2), %v176_v1, %v199_v9  ;;  %v224_v33 = vrot.slane (!%p139_p2), %v175_v10, %v211_v18 }
   0xc   : > { %v181_v4 = vsub.f32 (!%p139_p2), %v176_v1, %v179_v3 }
   0xd   : > { %s389_s16 = smov (!%p163_p3, %s310_s16), 15 }
   0xe   : > { %v182_v6 = vmax.f32 %v181_v4, 0.0  ;;  %s311_s17 = sshll.u32 %s389_s16, 3 }
   0xf   : > { %s166_s20 = scalar_lea.vmem %s384_s0, %s311_s17  ;;  %s172_s25 = scalar_lea.vmem %s387_s3, %s311_s17 }
  0x10   : > { %v183_v7 = vadd.f32 1e-05, %v182_v6  ;;  %v189_v13 = vld [vmem:[%s166_s20] sm:$0xff]  ;;  %v190_v14 = vld [vmem:[%s166_s20 + $0x8] sm:$0xff]  ;;  %v191_v15 = vld [vmem:[%s166_s20 + $0x10] sm:$0xff] }
  0x11   : > { %v192_v16 = vld [vmem:[%s166_s20 + $0x18] sm:$0xff]  ;;  %v193_v17 = vld [vmem:[%s166_s20 + $0x20] sm:$0xff]  ;;  %v194_v19 = vld [vmem:[%s166_s20 + $0x28] sm:$0xff]  ;;  %v201_v23 = vsub.f32 %v189_v13, %v200_v11  ;;  %v202_v25 = vsub.f32 %v190_v14, %v200_v11  ;;  %v203_v26 = vsub.f32 %v191_v15, %v200_v11 }
  0x12   : > { %324 = vrsqrt.f32 %v183_v7  ;;  %v195_v20 = vld [vmem:[%s166_s20 + $0x30] sm:$0xff]  ;;  %v196_v21 = vld [vmem:[%s166_s20 + $0x38] sm:$0xff]  ;;  %v204_v27 = vsub.f32 %v192_v16, %v200_v11  ;;  %v205_v28 = vsub.f32 %v193_v17, %v200_v11  ;;  %v206_v29 = vsub.f32 %v194_v19, %v200_v11 }
  0x13   : > { %v207_v30 = vsub.f32 %v195_v20, %v200_v11  ;;  %v208_v31 = vsub.f32 %v196_v21, %v200_v11 }
  0x1c   : > { %v325_v22 = vpop.eup %324 }
  0x1d   : > { %v188_v24 = vmul.f32 %v325_v22, %v186_v12 }
  0x1f   : > { %v212_v32 = vrot.slane %v188_v24, %v211_v18 }
  0x21   : > { %v213_v34 = vmul.f32 %v212_v32, %v201_v23  ;;  %v214_v35 = vmul.f32 %v212_v32, %v202_v25  ;;  %v215_v36 = vmul.f32 %v212_v32, %v203_v26  ;;  %v216_v37 = vmul.f32 %v212_v32, %v204_v27 }
  0x22   : > { %v217_v38 = vmul.f32 %v212_v32, %v205_v28  ;;  %v218_v39 = vmul.f32 %v212_v32, %v206_v29  ;;  %v219_v40 = vmul.f32 %v212_v32, %v207_v30  ;;  %v220_v41 = vmul.f32 %v212_v32, %v208_v31 }
  0x23   : > { %v225_v42 = vadd.f32 %v224_v33, %v213_v34  ;;  %v226_v43 = vadd.f32 %v224_v33, %v214_v35  ;;  %v227_v44 = vadd.f32 %v224_v33, %v215_v36  ;;  %v228_v45 = vadd.f32 %v224_v33, %v216_v37 }
  0x24   : > { %v229_v46 = vadd.f32 %v224_v33, %v217_v38  ;;  %v230_v47 = vadd.f32 %v224_v33, %v218_v39  ;;  %v231_v48 = vadd.f32 %v224_v33, %v219_v40  ;;  %v232_v49 = vadd.f32 %v224_v33, %v220_v41 }
  0x25   : > { %v233_v50 = vmax.f32 %v225_v42, 0.0  ;;  %v234_v51 = vmax.f32 %v226_v43, 0.0  ;;  %v235_v52 = vmax.f32 %v227_v44, 0.0  ;;  %v236_v53 = vmax.f32 %v228_v45, 0.0 }
  0x26   : > { %v237_v54 = vmax.f32 %v229_v46, 0.0  ;;  %v238_v55 = vmax.f32 %v230_v47, 0.0  ;;  %v239_v56 = vmax.f32 %v231_v48, 0.0  ;;  %v240_v57 = vmax.f32 %v232_v49, 0.0 }
  0x27   : > { %241 = vst [vmem:[%s172_s25] sm:$0xff] %v233_v50  ;;  %242 = vst [vmem:[%s172_s25 + $0x8] sm:$0xff] %v234_v51 }
  0x28   : > { %243 = vst [vmem:[%s172_s25 + $0x10] sm:$0xff] %v235_v52  ;;  %244 = vst [vmem:[%s172_s25 + $0x18] sm:$0xff] %v236_v53 }
  0x29   : > { %245 = vst [vmem:[%s172_s25 + $0x20] sm:$0xff] %v237_v54  ;;  %246 = vst [vmem:[%s172_s25 + $0x28] sm:$0xff] %v238_v55 }
  0x2a   : > { %247 = vst [vmem:[%s172_s25 + $0x30] sm:$0xff] %v239_v56  ;;  %248 = vst [vmem:[%s172_s25 + $0x38] sm:$0xff] %v240_v57 }
  0x2b PF: > { %s13_s12 = sadd.s32 1, %s332_s12  }
  0x2c   : > { %p10_p4 = scmp.ge.s32.totalorder %s13_s12, 4  }
  0x2e   :  { %12 = sbr.rel (!%p10_p4) target bundleno = 1 (0x1), region = 62 }

// kernel: residual_block_forward.4
= control target key start
LH: loop header
LB: loop body
LE: loop exit
PB: predicated region body
PF: predicated region fallthrough
CT: control target
= control target key end

     0   :  { %s514_s12 = smov 0   ;;  %s563_s0 = inlined_call_operand.vmem [shape: bf16[128,36], index: 0, kind: input, shape index: {}]   ;;  %s564_s1 = inlined_call_operand.vmem [shape: bf16[36,128], index: 1, kind: input, shape index: {}]   ;;  %s565_s2 = inlined_call_operand.vmem [shape: f32[128,128], index: 2, kind: output, shape index: {0}]   ;;  %s566_s3 = inlined_call_operand.vmem [shape: f32[2,128], index: 3, kind: output, shape index: {1}]  }
   0x1 LB: > { %s417_s13 = sadd.s32 4294967295, %s491_s12   ;;  %p421_p0 = scmp.ge.s32.totalorder %s491_s12, 1  ;;  %s491_s12 = sphi %s514_s12, %s14_s12  }
   0x2   : > { %p136_p1 = scmp.lt.s32.totalorder %s491_s12, 3 }
   0x4   : > { %p137_p2 = pnand %p421_p0, %p136_p1 }
   0x5   : > { %s422_s14 = sshll.u32 (!%p137_p2), %s417_s13, 3  ;;  %p426_p4 = scmp.ne.s32.totalorder (!%p137_p2), %s417_s13, 0 }
   0x6   : > { %140 = sbr.rel (%p137_p2) target bundleno = 280 (0x118), region = 28  ;;  %p161_p3 = scmp.lt.s32.totalorder (!%p137_p2), %s422_s14, 15 }
   0xd   : > { %s568_s14 = smov (!%p161_p3, %s422_s14), 15  ;;  %176 = sbr.rel (%p426_p4) target bundleno = 20 (0x14), region = 32 }
   0xe   : > { %s423_s15 = sshll.u32 %s568_s14, 2  ;;  %s425_s16 = sshll.u32 %s568_s14, 3  ;;  %v493_v0 = vmov (!%p426_p4), 0.0  }
   0xf   : > { %s164_s19 = scalar_lea.vmem %s563_s0, %s423_s15  ;;  %s528_s22 = scalar_lea.vmem %s565_s2, %s425_s16  ;;  %177 = vst [vmem:[%s566_s3] sm:$0x3] (!%p426_p4), %v493_v0 }
  0x14 PF: > { %v478_v1 = vld [vmem:[%s564_s1] sm:$0xff]   ;;  %v479_v2 = vld [vmem:[%s564_s1 + $0x8] sm:$0xff]   ;;  %vm226_vm0 = vcmask 293888   ;;  %v480_v3 = vld [vmem:[%s564_s1 + $0x10] ss:$0 sps:$4 sm:$0x33]  }
  0x15   : > { %447 = vmatprep.subr.bf16.mxu0 %v478_v1  ;;  %461 = vmatprep.subr.bf16.mxu1 %v478_v1  ;;  %v481_v4 = vld [vmem:[%s164_s19] sm:$0xff]   ;;  %vm239_vm1 = vcmask 1041408   ;;  %v483_v5 = vld [vmem:[%s164_s19 + $0x10] sm:$0xff]   ;;  %v482_v7 = vld [vmem:[%s164_s19 + $0x8] sm:$0xff]   ;;  %vm351_vm2 = vcmask 1040384  }
  0x16   : > { %448 = vmatpush3.bf16.msra.mxu0 %v478_v1  ;;  %464 = vmatpush3.bf16.msra.mxu1 %v478_v1  ;;  %v241_v6 = vsel %vm239_vm1, %v480_v3, 0  ;;  %v484_v8 = vld [vmem:[%s164_s19 + $0x18] sm:$0xff]   ;;  %v316_v49 = vld [vmem:[%s566_s3] sm:$0x3] }
  0x17   : > { %449 = vmatprep.subr.bf16.mxu0 %v479_v2  ;;  %462 = vmatprep.subr.bf16.mxu1 %v479_v2 }
  0x18   : > { %453 = vmatprep.mubr.msk.bf16.mxu0 %vm226_vm0, %v481_v4  ;;  %457 = vmatprep.mubr.msk.bf16.mxu1 %vm226_vm0, %v483_v5 }
  0x1a   : > { %450 = vmatpush3.bf16.msra.mxu0 %v479_v2  ;;  %465 = vmatpush3.bf16.msra.mxu1 %v479_v2 }
  0x1b   : > { %467 = vmatprep.subr.msk.bf16.mxu0 %vm239_vm1, %v480_v3  ;;  %468 = vmatprep.subr.msk.bf16.mxu1 %vm239_vm1, %v480_v3 }
  0x1e   : > { %452 = vmatpush3.bf16.msra.mxu0 %v241_v6  ;;  %466 = vmatpush3.bf16.msra.mxu1 %v241_v6 }
  0x21   : > { %454 = vmatmul.mubr.msk.bf16.vlgmr.msra.gmra.mrb[0].mxu0 %vm226_vm0, %v482_v7  ;;  %458 = vmatmul.mubr.msk.bf16.vlgmr.msra.gmra.mrb[0].mxu1 %vm226_vm0, %v484_v8 }
  0xf4   : > { %v455_v9 = vpop.f32.mrb[0].mxu0  ;;  %v459_v10 = vpop.f32.mrb[0].mxu1 }
  0xf5   : > { %310 = vst [vmem:[%s528_s22 + $0x10] sm:$0xff] %v455_v9  ;;  %v277_v11 = vpop.f32.mrb[1].mxu0  ;;  %314 = vst [vmem:[%s528_s22 + $0x30] sm:$0xff] %v459_v10  ;;  %v293_v12 = vpop.f32.mrb[1].mxu1  ;;  %v332_v20 = vmul.f32 %v455_v9, %v455_v9  ;;  %v336_v32 = vmul.f32 %v459_v10, %v459_v10 }
  0xf6   : > { %308 = vst [vmem:[%s528_s22] sm:$0xff] %v277_v11  ;;  %v456_v13 = vpop.f32.mrb[2].mxu0  ;;  %312 = vst [vmem:[%s528_s22 + $0x20] sm:$0xff] %v293_v12  ;;  %v460_v14 = vpop.f32.mrb[2].mxu1  ;;  %v330_v17 = vmul.f32 %v277_v11, %v277_v11  ;;  %v334_v26 = vmul.f32 %v293_v12, %v293_v12 }
  0xf7   : > { %311 = vst [vmem:[%s528_s22 + $0x18] sm:$0xff] %v456_v13  ;;  %v280_v15 = vpop.f32.mrb[3].mxu0  ;;  %315 = vst [vmem:[%s528_s22 + $0x38] sm:$0xff] %v460_v14  ;;  %v296_v16 = vpop.f32.mrb[3].mxu1  ;;  %v333_v23 = vmul.f32 %v456_v13, %v456_v13  ;;  %v337_v35 = vmul.f32 %v460_v14, %v460_v14 }
  0xf8   : > { %309 = vst [vmem:[%s528_s22 + $0x8] sm:$0xff] %v280_v15  ;;  %v317_v18 = vadd.f32 %v280_v15, %v277_v11  ;;  %v331_v19 = vmul.f32 %v280_v15, %v280_v15  ;;  %313 = vst [vmem:[%s528_s22 + $0x28] sm:$0xff] %v296_v16  ;;  %v335_v31 = vmul.f32 %v296_v16, %v296_v16 }
  0xfa   : > { %v318_v21 = vadd.f32 %v455_v9, %v317_v18  ;;  %v338_v22 = vadd.f32 %v331_v19, %v330_v17 }
  0xfc   : > { %v339_v24 = vadd.f32 %v338_v22, %v332_v20  ;;  %v319_v25 = vadd.f32 %v456_v13, %v318_v21 }
  0xfe   : > { %v320_v27 = vadd.f32 %v319_v25, %v293_v12  ;;  %v340_v28 = vadd.f32 %v339_v24, %v333_v23 }
 0x100   : > { %v341_v29 = vadd.f32 %v340_v28, %v334_v26  ;;  %v321_v30 = vadd.f32 %v320_v27, %v296_v16 }
 0x102   : > { %v322_v33 = vadd.f32 %v459_v10, %v321_v30  ;;  %v342_v34 = vadd.f32 %v341_v29, %v335_v31 }
 0x104   : > { %v323_v36 = vadd.f32 %v460_v14, %v322_v33  ;;  %v343_v37 = vadd.f32 %v342_v34, %v336_v32 }
 0x106   : > { %v324_v38 = vrot.slane %v323_v36, 4  ;;  %v344_v39 = vadd.f32 %v343_v37, %v337_v35 }
 0x108   : > { %v325_v40 = vadd.f32 %v324_v38, %v323_v36  ;;  %v345_v41 = vrot.slane %v344_v39, 4 }
 0x10a   : > { %v326_v42 = vrot.slane %v325_v40, 2  ;;  %v346_v43 = vadd.f32 %v345_v41, %v344_v39 }
 0x10c   : > { %v327_v44 = vadd.f32 %v326_v42, %v325_v40  ;;  %v347_v45 = vrot.slane %v346_v43, 2 }
 0x10e   : > { %v328_v46 = vrot.slane %v327_v44, 1  ;;  %v348_v47 = vadd.f32 %v347_v45, %v346_v43 }
 0x110   : > { %v349_v48 = vrot.slane %v348_v47, 1  ;;  %v329_v50 = vadd.f32 %v328_v46, %v327_v44 }
 0x112   : > { %v350_v51 = vadd.f32 %v349_v48, %v348_v47 }
 0x114   : > { %v352_v52 = vsel %vm351_vm2, %v329_v50, %v350_v51 }
 0x115   : > { %v353_v53 = vadd.f32 %v352_v52, %v316_v49 }
 0x117   : > { %354 = vst [vmem:[%s566_s3] sm:$0x3] %v353_v53 }
 0x118 PF: > { %s14_s12 = sadd.s32 1, %s491_s12  }
 0x119   : > { %p11_p5 = scmp.ge.s32.totalorder %s14_s12, 4  }
 0x11b   :  { %13 = sbr.rel (!%p11_p5) target bundleno = 1 (0x1), region = 70 }

// kernel: residual_block_forward.7
= control target key start
LH: loop header
LB: loop body
LE: loop exit
PB: predicated region body
PF: predicated region fallthrough
CT: control target
= control target key end

     0   :  { %11 = vsyncpa [#allocation3], 0  ;;  %s848_s0 = inlined_call_operand.vmem [shape: f32[128,128], index: 0, kind: input, shape index: {}]   ;;  %s849_s1 = inlined_call_operand.vmem [shape: f32[2,128], index: 1, kind: input, shape index: {}]   ;;  %s850_s2 = inlined_call_operand.vmem [shape: f32[2,128], index: 2, kind: input, shape index: {}]   ;;  %s851_s3 = inlined_call_operand.vmem [shape: f32[128,128], index: 3, kind: input, shape index: {}]   ;;  %s852_s4 = inlined_call_operand.vmem [shape: f32[2,128], index: 4, kind: input, shape index: {}]   ;;  %s853_s5 = inlined_call_operand.vmem [shape: f32[2,128], index: 5, kind: input, shape index: {}]   ;;  %s854_s6 = inlined_call_operand.hbm [shape: f32[128,128], index: 6, kind: output, shape index: {}]  }
   0x1   :  { %13 = vsyncpa [#allocation3 + $0x1], 0  ;;  %s667_s21 = smov 0   ;;  %s669_s22 = smov 0  }
   0x2   :  { %s671_s23 = smov 0   ;;  %s673_s24 = smov 0  }
   0x3 LB: > { %s688_s25 = sadd.s32 4294967295, %s627_s24   ;;  %s505_s26 = sadd.s32 4294967294, %s627_s24   ;;  %s627_s24 = sphi %s673_s24, %s860_s24   ;;  %s623_s23 = sphi %s671_s23, %s859_s23   ;;  %s619_s22 = sphi %s669_s22, %s858_s22   ;;  %s615_s21 = sphi %s667_s21, %s857_s21  }
   0x4   : > { %s692_s27 = sadd.s32 1, %s627_s24   ;;  %s162_s28 = sadd.s32 1, %s623_s23 }
   0x5   : > { %s159_s29 = ssub.s32 %s627_s24, %s692_s27  ;;  %p172_p0 = scmp.ne.s32.totalorder %s623_s23, %s619_s22 }
   0x6   : > { %p160_p1 = scmp.eq.s32.totalorder %s159_s29, 0  ;;  %p173_p2 = scmp.eq.s32.totalorder %s688_s25, 1 }
   0x7   : > { %p178_p3 = scmp.ne.s32.totalorder %s619_s22, %s615_s21  ;;  %p179_p4 = scmp.eq.s32.totalorder %s505_s26, 1 }
   0x8   : > { %s703_s30 = scalar_select %p160_p1, %s623_s23, %s162_s28  }
   0x9   : > { %p705_p5 = por %p173_p2, %p172_p0  ;;  %p709_p6 = por %p179_p4, %p178_p3 }
   0xa   : > { %p508_p7 = scmp.ge.s32.totalorder %s627_s24, 1  ;;  %p227_p8 = scmp.lt.s32.totalorder %s627_s24, 3 }
   0xc   : > { %p228_p9 = pnand %p508_p7, %p227_p8 }
   0xd   : > { %v275_v0 = vld [vmem:[%s849_s1] sm:$0x3] (!%p228_p9)  ;;  %s510_s13 = sshll.u32 (!%p228_p9), %s688_s25, 3  ;;  %v298_v9 = vlaneseq (!%p228_p9)  ;;  %s259_s10 = sand.u32 (!%p228_p9), 1, %s619_s22  }
   0xe   : > { %231 = sbr.rel (%p228_p9) target bundleno = 73 (0x49), region = 44  ;;  %v277_v1 = vmul.f32 (!%p228_p9), 0.0078125, %v275_v0  ;;  %v334_v2 = vld [vmem:[%s852_s4] sm:$0x3] (!%p228_p9)  ;;  %p263_p10 = scmp.lt.s32.totalorder (!%p228_p9), %s510_s13, 15 }
   0xf   : > { %v336_v3 = vmul.f32 (!%p228_p9), 0.0078125, %v334_v2  ;;  %v299_v14 = vshrl.u32 (!%p228_p9), %v298_v9, 7  ;;  %v276_v17 = vld [vmem:[%s850_s2] sm:$0x3] (!%p228_p9)  ;;  %s509_s11 = sshll.u32 (!%p228_p9), %s259_s10, 6  ;;  %s629_s19 = smov (!%p228_p9), [#allocation2]  }
  0x10   : > { %v278_v4 = vmul.f32 (!%p228_p9), %v277_v1, %v277_v1  ;;  %v335_v18 = vld [vmem:[%s853_s5] sm:$0x3] (!%p228_p9)  ;;  %v287_v22 = vrot.slane (!%p228_p9), %v276_v17, 7  ;;  %s261_s12 = scalar_lea.vmem (!%p228_p9), [#allocation2], %s509_s11 }
  0x11   : > { %v337_v5 = vmul.f32 (!%p228_p9), %v336_v3, %v336_v3  ;;  %v300_v16 = vsub.s32 (!%p228_p9), 0, %v299_v14  ;;  %v312_v23 = vsub.s32 (!%p228_p9), 1, %v299_v14  ;;  %v346_v27 = vrot.slane (!%p228_p9), %v335_v18, 7 }
  0x12   : > { %v280_v6 = vrot.slane (!%p228_p9), %v278_v4, 7 }
  0x13   : > { %v339_v7 = vrot.slane (!%p228_p9), %v337_v5, 7  ;;  %v739_v20 = vrot.slane (!%p228_p9), %v277_v1, %v300_v16  ;;  %v741_v21 = vrot.slane (!%p228_p9), %v336_v3, %v300_v16  ;;  %v749_v31 = vrot.slane (!%p228_p9), %v276_v17, %v312_v23 }
  0x14   : > { %v282_v8 = vsub.f32 (!%p228_p9), %v277_v1, %v280_v6  ;;  %v751_v32 = vrot.slane (!%p228_p9), %v335_v18, %v312_v23 }
  0x15   : > { %v341_v10 = vsub.f32 %v336_v3, %v339_v7  ;;  %s862_s13 = smov (!%p263_p10, %s510_s13), 15 }
  0x16   : > { %v283_v11 = vmax.f32 %v282_v8, 0.0  ;;  %s511_s14 = sshll.u32 %s862_s13, 3  ;;  %s431_s13 = sshll.u32 %s261_s12, 4  ;;  %s798_s13 = int_to_ptr.vmem [resolvable:$true] %s431_s13 }
  0x17   : > { %v342_v12 = vmax.f32 %v341_v10, 0.0  ;;  %s725_s17 = scalar_lea.vmem %s848_s0, %s511_s14  ;;  %s730_s20 = scalar_lea.vmem %s851_s3, %s511_s14 }
  0x18   : > { %v284_v13 = vadd.f32 1e-05, %v283_v11  ;;  %v290_v19 = vld [vmem:[%s725_s17] sm:$0xff]  ;;  %v291_v25 = vld [vmem:[%s725_s17 + $0x8] sm:$0xff]  ;;  %v292_v28 = vld [vmem:[%s725_s17 + $0x10] sm:$0xff]  ;;  %s519_s14 = sshll.u32 %s688_s25, 10 }
  0x19   : > { %v343_v15 = vadd.f32 1e-05, %v342_v12  ;;  %v349_v24 = vld [vmem:[%s730_s20] sm:$0xff]  ;;  %v350_v26 = vld [vmem:[%s730_s20 + $0x8] sm:$0xff]  ;;  %v351_v29 = vld [vmem:[%s730_s20 + $0x10] sm:$0xff]  ;;  %v302_v37 = vsub.f32 %v290_v19, %v739_v20  ;;  %v303_v39 = vsub.f32 %v291_v25, %v739_v20  ;;  %v304_v46 = vsub.f32 %v292_v28, %v739_v20  ;;  %s807_s25 = scalar_lea.sflag [#allocation3], %s259_s10 }
  0x1a   : > { %561 = vrsqrt.f32 %v284_v13  ;;  %v293_v30 = vld [vmem:[%s725_s17 + $0x18] sm:$0xff]  ;;  %v294_v34 = vld [vmem:[%s725_s17 + $0x20] sm:$0xff]  ;;  %v361_v38 = vsub.f32 %v349_v24, %v741_v21  ;;  %v362_v40 = vsub.f32 %v350_v26, %v741_v21  ;;  %v295_v41 = vld [vmem:[%s725_s17 + $0x28] sm:$0xff]  ;;  %v363_v47 = vsub.f32 %v351_v29, %v741_v21  ;;  %s565_s18 = scalar_lea.vmem %s798_s13, 1024 }
  0x1b   : > { %563 = vrsqrt.f32 %v343_v15  ;;  %v352_v33 = vld [vmem:[%s730_s20 + $0x18] sm:$0xff]  ;;  %v353_v35 = vld [vmem:[%s730_s20 + $0x20] sm:$0xff]  ;;  %v354_v42 = vld [vmem:[%s730_s20 + $0x28] sm:$0xff]  ;;  %v305_v48 = vsub.f32 %v293_v30, %v739_v20  ;;  %v306_v54 = vsub.f32 %v294_v34, %v739_v20  ;;  %v307_v57 = vsub.f32 %v295_v41, %v739_v20  ;;  %p566_p11 = scmp.ne.s32.totalorder %s798_s13, %s565_s18 }
  0x1c   : > { %v296_v43 = vld [vmem:[%s725_s17 + $0x30] sm:$0xff]  ;;  %v297_v50 = vld [vmem:[%s725_s17 + $0x38] sm:$0xff]  ;;  %v364_v53 = vsub.f32 %v352_v33, %v741_v21  ;;  %v365_v55 = vsub.f32 %v353_v35, %v741_v21  ;;  %v366_v58 = vsub.f32 %v354_v42, %v741_v21  ;;  %s803_s17 = scalar_lea.hbm %s854_s6, %s519_s14 }
  0x1d   : > { %v355_v49 = vld [vmem:[%s730_s20 + $0x30] sm:$0xff]  ;;  %v356_v51 = vld [vmem:[%s730_s20 + $0x38] sm:$0xff]  ;;  %v308_v59 = vsub.f32 %v296_v43, %v739_v20  ;;  %v309_v62 = vsub.f32 %v297_v50, %v739_v20  ;;  %p567_p12 = pnand %p566_p11, %p705_p5  ;;  %s569_s20 = sshll.u32 %s629_s19, 4  ;;  %s570_s20 = int_to_ptr.vmem [resolvable:$false] %s569_s20 }
  0x1e   : > { %v367_v61 = vsub.f32 %v355_v49, %v741_v21  ;;  %v368_v63 = vsub.f32 %v356_v51, %v741_v21  ;;  %s571_s26 = scalar_lea.vmem %s570_s20, 2048  ;;  %p572_p0 = scmp.lt.s32.totalorder %s798_s13, %s570_s20 }
  0x1f   : > { %p568_p13 = pneg %p567_p12  ;;  %p573_p1 = scmp.lt.s32.totalorder %s571_s26, %s565_s18 }
  0x21   : > { %p574_p2 = por %p573_p1, %p572_p0 }
  0x23   : > { %p575_p3 = pnand %p574_p2, %p568_p13 }
  0x24   : > { %v562_v36 = vpop.eup %561 }
  0x25   : > { %v564_v44 = vpop.eup %563  ;;  %v289_v45 = vmul.f32 %v562_v36, %v287_v22 }
  0x26   : > { %v348_v52 = vmul.f32 %v564_v44, %v346_v27 }
  0x27   : > { %v313_v56 = vrot.slane %v289_v45, %v312_v23 }
  0x28   : > { %v372_v60 = vrot.slane %v348_v52, %v312_v23 }
  0x29   : > { %v314_v0 = vmul.f32 %v313_v56, %v302_v37  ;;  %v315_v1 = vmul.f32 %v313_v56, %v303_v39  ;;  %v316_v2 = vmul.f32 %v313_v56, %v304_v46  ;;  %v317_v3 = vmul.f32 %v313_v56, %v305_v48 }
  0x2a   : > { %v373_v4 = vmul.f32 %v372_v60, %v361_v38  ;;  %v374_v5 = vmul.f32 %v372_v60, %v362_v40  ;;  %v375_v6 = vmul.f32 %v372_v60, %v363_v47  ;;  %v376_v7 = vmul.f32 %v372_v60, %v364_v53 }
  0x2b   : > { %v326_v8 = vadd.f32 %v749_v31, %v314_v0  ;;  %v327_v9 = vadd.f32 %v749_v31, %v315_v1  ;;  %v328_v10 = vadd.f32 %v749_v31, %v316_v2  ;;  %v329_v11 = vadd.f32 %v749_v31, %v317_v3 }
  0x2c   : > { %v385_v12 = vadd.f32 %v751_v32, %v373_v4  ;;  %v386_v13 = vadd.f32 %v751_v32, %v374_v5  ;;  %v387_v14 = vadd.f32 %v751_v32, %v375_v6  ;;  %v388_v15 = vadd.f32 %v751_v32, %v376_v7 }
  0x2d   : > { %v318_v16 = vmul.f32 %v313_v56, %v306_v54  ;;  %v377_v17 = vmul.f32 %v372_v60, %v365_v55  ;;  %v319_v18 = vmul.f32 %v313_v56, %v307_v57  ;;  %v378_v19 = vmul.f32 %v372_v60, %v366_v58 }
  0x2e   : > { %v393_v20 = vadd.f32 %v385_v12, %v326_v8  ;;  %v394_v21 = vadd.f32 %v386_v13, %v327_v9  ;;  %v395_v22 = vadd.f32 %v387_v14, %v328_v10  ;;  %v396_v23 = vadd.f32 %v388_v15, %v329_v11 }
  0x2f   : > { %v330_v24 = vadd.f32 %v749_v31, %v318_v16  ;;  %v389_v25 = vadd.f32 %v751_v32, %v377_v17  ;;  %v331_v26 = vadd.f32 %v749_v31, %v319_v18  ;;  %v390_v27 = vadd.f32 %v751_v32, %v378_v19 }
  0x30   : > { %v401_v28 = vmax.f32 %v393_v20, 0.0  ;;  %v402_v29 = vmax.f32 %v394_v21, 0.0  ;;  %v403_v30 = vmax.f32 %v395_v22, 0.0  ;;  %v404_v33 = vmax.f32 %v396_v23, 0.0 }
  0x31   : > { %v397_v34 = vadd.f32 %v389_v25, %v330_v24  ;;  %v398_v35 = vadd.f32 %v390_v27, %v331_v26  ;;  %v320_v36 = vmul.f32 %v313_v56, %v308_v59  ;;  %v379_v37 = vmul.f32 %v372_v60, %v367_v61 }
  0x32   : > { %409 = vst [vmem:[%s261_s12] sm:$0xff] %v401_v28  ;;  %410 = vst [vmem:[%s261_s12 + $0x8] sm:$0xff] %v402_v29  ;;  %v321_v38 = vmul.f32 %v313_v56, %v309_v62  ;;  %v380_v39 = vmul.f32 %v372_v60, %v368_v63 }
  0x33   : > { %411 = vst [vmem:[%s261_s12 + $0x10] sm:$0xff] %v403_v30  ;;  %412 = vst [vmem:[%s261_s12 + $0x18] sm:$0xff] %v404_v33  ;;  %v405_v40 = vmax.f32 %v397_v34, 0.0  ;;  %v406_v41 = vmax.f32 %v398_v35, 0.0  ;;  %v332_v42 = vadd.f32 %v749_v31, %v320_v36  ;;  %v391_v43 = vadd.f32 %v751_v32, %v379_v37 }
  0x34   : > { %v333_v44 = vadd.f32 %v749_v31, %v321_v38  ;;  %v392_v45 = vadd.f32 %v751_v32, %v380_v39 }
  0x35   : > { %413 = vst [vmem:[%s261_s12 + $0x20] sm:$0xff] %v405_v40  ;;  %414 = vst [vmem:[%s261_s12 + $0x28] sm:$0xff] %v406_v41  ;;  %v399_v46 = vadd.f32 %v391_v43, %v332_v42 }
  0x36   : > { %v400_v47 = vadd.f32 %v392_v45, %v333_v44 }
  0x37   : > { %v407_v48 = vmax.f32 %v399_v46, 0.0 }
  0x38   : > { %v408_v31 = vmax.f32 %v400_v47, 0.0 }
  0x39   : > { %415 = vst [vmem:[%s261_s12 + $0x30] sm:$0xff] %v407_v48 }
  0x3a   : > { %416 = vst [vmem:[%s261_s12 + $0x38] sm:$0xff] %v408_v31 }
  0x3b   : > { %578 = shalt.err (!%p575_p3)
}
  0x3c   : > { %s579_s28 = scalar_lea.hbm %s803_s17, 1024  ;;  %s583_s10 = scalar_lea.hbm %s854_s6, 2048 }
  0x3d   : > { %p580_p4 = scmp.ne.s32.totalorder %s803_s17, %s579_s28  ;;  %p584_p9 = scmp.lt.u32.totalorder %s803_s17, %s854_s6 }
  0x3e   : > { %p585_p10 = scmp.lt.u32.totalorder %s583_s10, %s579_s28  ;;  %p587_p12 = scmp.lt.u32.totalorder %s579_s28, %s803_s17 }
  0x3f   : > { %p581_p7 = pnand %p580_p4, %p705_p5 }
  0x40   : > { %p586_p11 = por %p585_p10, %p584_p9 }
  0x41   : > { %p582_p8 = pneg %p581_p7 }
  0x42   : > { %p588_p13 = por %p587_p12, %p586_p11 }
  0x44   : > { %p589_p0 = pnand %p588_p13, %p582_p8 }
  0x46   : > { %592 = shalt.err (!%p589_p0)
}
  0x47   : > { %s630_s14 = smov 128   ;;  %s631_s15 = smov 8  }
  0x48   : > { %520 = dma.vmem_to_hbm [thread:$0]  (%p705_p5), %s798_s13, 1024, %s803_s17, %s807_s25, %s630_s14, %s630_s14, %s631_s15  }
  0x49 PF: > { %p526_p1 = scmp.ge.s32.totalorder %s627_s24, 2  ;;  %s446_s16 = sand.u32 1, %s615_s21  }
  0x4a   : > { %s447_s18 = scalar_lea.sflag [#allocation3], %s446_s16 }
  0x4b   : > { %p523_p2 = pnand %p526_p1, %p709_p6 }
  0x4d   : > { %610 = dma.done.wait (!%p523_p2), %s447_s18, 1024  }
  0x4e   : > { %612 = vsyncadd (!%p523_p2), %s447_s18, 4294966272  ;;  %p16_p3 = scmp.ge.s32.totalorder %s692_s27, 4   ;;  %s857_s21 = smov %s619_s22 }
  0x4f   : > { %s858_s22 = smov %s623_s23  ;;  %s859_s23 = smov %s703_s30 }
  0x50   : > { %s860_s24 = smov %s692_s27  ;;  %18 = sbr.rel (!%p16_p3) target bundleno = 3 (0x3), region = 82 }
  0x57   :  { %452 = vsyncpa [#allocation3], 1 }
  0x58   :  { %454 = vsyncpa [#allocation3 + $0x1], 1 }

// kernel: residual_block_forward.6
= control target key start
LH: loop header
LB: loop body
LE: loop exit
PB: predicated region body
PF: predicated region fallthrough
CT: control target
= control target key end

     0   :  { %s935_s24 = smov 0   ;;  %s1036_s0 = inlined_call_operand.vmem [shape: bf16[128,72], index: 0, kind: input, shape index: {}]   ;;  %s1037_s1 = inlined_call_operand.vmem [shape: bf16[72,128], index: 1, kind: input, shape index: {}]   ;;  %s1038_s2 = inlined_call_operand.vmem [shape: bf16[128,4], index: 2, kind: input, shape index: {}]   ;;  %s1039_s3 = inlined_call_operand.vmem [shape: bf16[4,128], index: 3, kind: input, shape index: {}]   ;;  %s1040_s4 = inlined_call_operand.vmem [shape: f32[128,128], index: 4, kind: output, shape index: {0}]   ;;  %s1041_s5 = inlined_call_operand.vmem [shape: f32[128,128], index: 5, kind: output, shape index: {1}]   ;;  %s1042_s6 = inlined_call_operand.vmem [shape: f32[2,128], index: 6, kind: output, shape index: {2}]   ;;  %s1043_s7 = inlined_call_operand.vmem [shape: f32[2,128], index: 7, kind: output, shape index: {3}]  }
   0x1 LB: > { %s783_s25 = sadd.s32 4294967295, %s892_s24   ;;  %p787_p0 = scmp.ge.s32.totalorder %s892_s24, 1  ;;  %s892_s24 = sphi %s935_s24, %s18_s24  }
   0x2   : > { %p246_p1 = scmp.lt.s32.totalorder %s892_s24, 3 }
   0x4   : > { %p247_p2 = pnand %p787_p0, %p246_p1 }
   0x5   : > { %s788_s26 = sshll.u32 (!%p247_p2), %s783_s25, 3  ;;  %p796_p4 = scmp.ne.s32.totalorder (!%p247_p2), %s783_s25, 0 }
   0x6   : > { %250 = sbr.rel (%p247_p2) target bundleno = 288 (0x120), region = 36  ;;  %p289_p3 = scmp.lt.s32.totalorder (!%p247_p2), %s788_s26, 15 }
   0xd   : > { %s1045_s26 = smov (!%p289_p3, %s788_s26), 15  ;;  %316 = sbr.rel (%p796_p4) target bundleno = 20 (0x14), region = 40 }
   0xe   : > { %s789_s27 = sshll.u32 %s1045_s26, 2  ;;  %s793_s28 = sshll.u32 %s1045_s26, 3  ;;  %v894_v0 = vmov (!%p796_p4), 0.0  }
   0xf   : > { %s946_s8 = scalar_lea.vmem %s1036_s0, %s789_s27  ;;  %s951_s11 = scalar_lea.vmem %s1038_s2, %s789_s27  ;;  %317 = vst [vmem:[%s1042_s6] sm:$0x3] (!%p796_p4), %v894_v0  ;;  %318 = vst [vmem:[%s1043_s7] sm:$0x3] (!%p796_p4), %v894_v0 }
  0x10   : > { %s956_s14 = scalar_lea.vmem %s1040_s4, %s793_s28  ;;  %s961_s17 = scalar_lea.vmem %s1041_s5, %s793_s28 }
  0x14 PF: > { %v873_v1 = vld [vmem:[%s1037_s1] sm:$0xff]   ;;  %vm554_vm0 = vcmask 1041408   ;;  %v874_v4 = vld [vmem:[%s1037_s1 + $0x8] sm:$0xff]   ;;  %vm541_vm1 = vcmask 31744   ;;  %v877_v7 = vld [vmem:[%s1037_s1 + $0x10] sm:$0xff]   ;;  %vm383_vm2 = vcmask 588800  }
  0x15   : > { %v520_v2 = vld [vmem:[%s1039_s3] sm:$0x3]  ;;  %834 = vmatprep.subr.bf16.mxu0 %v873_v1  ;;  %v876_v6 = vld [vmem:[%s951_s11 + $0x8] sm:$0xff]   ;;  %v879_v8 = vld [vmem:[%s951_s11 + $0x10] sm:$0xff]   ;;  %vm396_vm3 = vcmask 1043456   ;;  %vm508_vm4 = vcmask 1040384  }
  0x16   : > { %863 = vmatprep.subr.msk.bf16.mxu1 %vm554_vm0, %v520_v2  ;;  %v556_v3 = vsel %vm554_vm0, %v520_v2, 0  ;;  %835 = vmatpush3.bf16.msra.mxu0 %v873_v1  ;;  %v875_v5 = vld [vmem:[%s951_s11] sm:$0xff]   ;;  %v878_v9 = vld [vmem:[%s1037_s1 + $0x18] sm:$0xff]   ;;  %v883_v14 = vld [vmem:[%s946_s8 + $0x8] sm:$0xff]  }
  0x17   : > { %853 = vmatpush3.bf16.msra.mxu1 %v556_v3  ;;  %836 = vmatprep.subr.bf16.mxu0 %v874_v4  ;;  %v882_v10 = vld [vmem:[%s946_s8] sm:$0xff]   ;;  %v880_v11 = vld [vmem:[%s951_s11 + $0x18] sm:$0xff]   ;;  %v884_v15 = vld [vmem:[%s946_s8 + $0x10] sm:$0xff]  }
  0x18   : > { %854 = vmatprep.mubr.msk.bf16.mxu1 %vm541_vm1, %v875_v5  ;;  %844 = vmatprep.mubr.msk.bf16.mxu0 %vm383_vm2, %v882_v10  ;;  %v881_v12 = vld [vmem:[%s1037_s1 + $0x20] ss:$0 sps:$4 sm:$0xff]   ;;  %v885_v16 = vld [vmem:[%s946_s8 + $0x18] sm:$0xff]  }
  0x19   : > { %v398_v13 = vsel %vm396_vm3, %v881_v12, 0 }
  0x1a   : > { %855 = vmatmul.mubr.msk.bf16.vlgmr.msra.gmra.mrb[0].mxu1 %vm541_vm1, %v876_v6  ;;  %837 = vmatpush3.bf16.msra.mxu0 %v874_v4 }
  0x1b   : > { %838 = vmatprep.subr.bf16.mxu0 %v877_v7  ;;  %858 = vmatprep.mubr.msk.bf16.mxu1 %vm541_vm1, %v879_v8 }
  0x1e   : > { %839 = vmatpush3.bf16.msra.mxu0 %v877_v7 }
  0x1f   : > { %840 = vmatprep.subr.bf16.mxu0 %v878_v9 }
  0x22   : > { %859 = vmatmul.mubr.msk.bf16.gmra.mrb[4].mxu1 %vm541_vm1, %v880_v11  ;;  %841 = vmatpush3.bf16.msra.mxu0 %v878_v9 }
  0x23   : > { %862 = vmatprep.subr.msk.bf16.mxu0 %vm396_vm3, %v881_v12 }
  0x26   : > { %843 = vmatpush3.bf16.msra.mxu0 %v398_v13 }
  0x29   : > { %845 = vmatmul.mubr.msk.bf16.vlgmr.msra.gmra.mrb[0].mxu0 %vm383_vm2, %v883_v14 }
  0x2a   : > { %848 = vmatprep.mubr.msk.bf16.mxu0 %vm383_vm2, %v884_v15 }
  0x31   : > { %849 = vmatmul.mubr.msk.bf16.gmra.mrb[4].mxu0 %vm383_vm2, %v885_v16 }
  0xed   : > { %v856_v17 = vpop.f32.mrb[0].mxu1 }
  0xee   : > { %625 = vst [vmem:[%s961_s17 + $0x10] sm:$0xff] %v856_v17  ;;  %v592_v18 = vpop.f32.mrb[1].mxu1  ;;  %v647_v22 = vmul.f32 %v856_v17, %v856_v17 }
  0xef   : > { %623 = vst [vmem:[%s961_s17] sm:$0xff] %v592_v18  ;;  %v645_v19 = vmul.f32 %v592_v18, %v592_v18  ;;  %v857_v20 = vpop.f32.mrb[2].mxu1 }
  0xf0   : > { %626 = vst [vmem:[%s961_s17 + $0x18] sm:$0xff] %v857_v20  ;;  %v595_v21 = vpop.f32.mrb[3].mxu1  ;;  %v648_v25 = vmul.f32 %v857_v20, %v857_v20 }
  0xf1   : > { %624 = vst [vmem:[%s961_s17 + $0x8] sm:$0xff] %v595_v21  ;;  %v632_v23 = vadd.f32 %v595_v21, %v592_v18  ;;  %v646_v24 = vmul.f32 %v595_v21, %v595_v21 }
  0xf3   : > { %v633_v26 = vadd.f32 %v856_v17, %v632_v23  ;;  %v653_v27 = vadd.f32 %v646_v24, %v645_v19  ;;  %v631_v17 = vld [vmem:[%s1043_s7] sm:$0x3] }
  0xf5   : > { %v654_v28 = vadd.f32 %v653_v27, %v647_v22  ;;  %v860_v29 = vpop.f32.mrb[4].mxu1  ;;  %v634_v30 = vadd.f32 %v857_v20, %v633_v26 }
  0xf6   : > { %629 = vst [vmem:[%s961_s17 + $0x30] sm:$0xff] %v860_v29  ;;  %v608_v31 = vpop.f32.mrb[5].mxu1  ;;  %v651_v37 = vmul.f32 %v860_v29, %v860_v29 }
  0xf7   : > { %627 = vst [vmem:[%s961_s17 + $0x20] sm:$0xff] %v608_v31  ;;  %v635_v32 = vadd.f32 %v634_v30, %v608_v31  ;;  %v649_v33 = vmul.f32 %v608_v31, %v608_v31  ;;  %v655_v34 = vadd.f32 %v654_v28, %v648_v25  ;;  %v861_v35 = vpop.f32.mrb[6].mxu1 }
  0xf8   : > { %630 = vst [vmem:[%s961_s17 + $0x38] sm:$0xff] %v861_v35  ;;  %v611_v36 = vpop.f32.mrb[7].mxu1  ;;  %v652_v41 = vmul.f32 %v861_v35, %v861_v35 }
  0xf9   : > { %v656_v38 = vadd.f32 %v655_v34, %v649_v33  ;;  %628 = vst [vmem:[%s961_s17 + $0x28] sm:$0xff] %v611_v36  ;;  %v636_v39 = vadd.f32 %v635_v32, %v611_v36  ;;  %v650_v40 = vmul.f32 %v611_v36, %v611_v36 }
  0xfb   : > { %v637_v42 = vadd.f32 %v860_v29, %v636_v39  ;;  %v657_v43 = vadd.f32 %v656_v38, %v650_v40  ;;  %v473_v38 = vld [vmem:[%s1042_s6] sm:$0x3] }
  0xfc   : > { %v846_v46 = vpop.f32.mrb[0].mxu0 }
  0xfd   : > { %v638_v44 = vadd.f32 %v861_v35, %v637_v42  ;;  %v658_v45 = vadd.f32 %v657_v43, %v651_v37  ;;  %467 = vst [vmem:[%s956_s14 + $0x10] sm:$0xff] %v846_v46  ;;  %v434_v47 = vpop.f32.mrb[1].mxu0  ;;  %v489_v57 = vmul.f32 %v846_v46, %v846_v46 }
  0xfe   : > { %465 = vst [vmem:[%s956_s14] sm:$0xff] %v434_v47  ;;  %v847_v50 = vpop.f32.mrb[2].mxu0  ;;  %v487_v51 = vmul.f32 %v434_v47, %v434_v47 }
  0xff   : > { %v639_v48 = vrot.slane %v638_v44, 4  ;;  %v659_v49 = vadd.f32 %v658_v45, %v652_v41  ;;  %468 = vst [vmem:[%s956_s14 + $0x18] sm:$0xff] %v847_v50  ;;  %v437_v52 = vpop.f32.mrb[3].mxu0  ;;  %v490_v3 = vmul.f32 %v847_v50, %v847_v50 }
 0x100   : > { %466 = vst [vmem:[%s956_s14 + $0x8] sm:$0xff] %v437_v52  ;;  %v474_v55 = vadd.f32 %v437_v52, %v434_v47  ;;  %v488_v56 = vmul.f32 %v437_v52, %v437_v52 }
 0x101   : > { %v640_v53 = vadd.f32 %v639_v48, %v638_v44  ;;  %v660_v54 = vrot.slane %v659_v49, 4 }
 0x102   : > { %v475_v60 = vadd.f32 %v846_v46, %v474_v55  ;;  %v495_v61 = vadd.f32 %v488_v56, %v487_v51 }
 0x103   : > { %v641_v58 = vrot.slane %v640_v53, 2  ;;  %v661_v59 = vadd.f32 %v660_v54, %v659_v49 }
 0x104   : > { %v496_v0 = vadd.f32 %v495_v61, %v489_v57  ;;  %v850_v1 = vpop.f32.mrb[4].mxu0  ;;  %v476_v2 = vadd.f32 %v847_v50, %v475_v60 }
 0x105   : > { %v642_v62 = vadd.f32 %v641_v58, %v640_v53  ;;  %v662_v63 = vrot.slane %v661_v59, 2  ;;  %471 = vst [vmem:[%s956_s14 + $0x30] sm:$0xff] %v850_v1  ;;  %v450_v4 = vpop.f32.mrb[5].mxu0  ;;  %v493_v20 = vmul.f32 %v850_v1, %v850_v1 }
 0x106   : > { %469 = vst [vmem:[%s956_s14 + $0x20] sm:$0xff] %v450_v4  ;;  %v477_v7 = vadd.f32 %v476_v2, %v450_v4  ;;  %v491_v8 = vmul.f32 %v450_v4, %v450_v4  ;;  %v851_v9 = vpop.f32.mrb[6].mxu0  ;;  %v497_v10 = vadd.f32 %v496_v0, %v490_v3 }
 0x107   : > { %v643_v5 = vrot.slane %v642_v62, 1  ;;  %v663_v6 = vadd.f32 %v662_v63, %v661_v59  ;;  %472 = vst [vmem:[%s956_s14 + $0x38] sm:$0xff] %v851_v9  ;;  %v453_v11 = vpop.f32.mrb[7].mxu0  ;;  %v494_v25 = vmul.f32 %v851_v9, %v851_v9 }
 0x108   : > { %470 = vst [vmem:[%s956_s14 + $0x28] sm:$0xff] %v453_v11  ;;  %v478_v14 = vadd.f32 %v477_v7, %v453_v11  ;;  %v492_v15 = vmul.f32 %v453_v11, %v453_v11  ;;  %v498_v16 = vadd.f32 %v497_v10, %v491_v8 }
 0x109   : > { %v644_v12 = vadd.f32 %v643_v5, %v642_v62  ;;  %v664_v13 = vrot.slane %v663_v6, 1 }
 0x10a   : > { %v479_v19 = vadd.f32 %v850_v1, %v478_v14  ;;  %v499_v21 = vadd.f32 %v498_v16, %v492_v15 }
 0x10b   : > { %v665_v18 = vadd.f32 %v664_v13, %v663_v6 }
 0x10c   : > { %v480_v23 = vadd.f32 %v851_v9, %v479_v19  ;;  %v500_v26 = vadd.f32 %v499_v21, %v493_v20 }
 0x10d   : > { %v666_v22 = vsel %vm508_vm4, %v644_v12, %v665_v18 }
 0x10e   : > { %v667_v24 = vadd.f32 %v666_v22, %v631_v17  ;;  %v481_v27 = vrot.slane %v480_v23, 4  ;;  %v501_v28 = vadd.f32 %v500_v26, %v494_v25 }
 0x110   : > { %668 = vst [vmem:[%s1043_s7] sm:$0x3] %v667_v24  ;;  %v482_v29 = vadd.f32 %v481_v27, %v480_v23  ;;  %v502_v30 = vrot.slane %v501_v28, 4 }
 0x112   : > { %v483_v31 = vrot.slane %v482_v29, 2  ;;  %v503_v32 = vadd.f32 %v502_v30, %v501_v28 }
 0x114   : > { %v484_v33 = vadd.f32 %v483_v31, %v482_v29  ;;  %v504_v34 = vrot.slane %v503_v32, 2 }
 0x116   : > { %v485_v35 = vrot.slane %v484_v33, 1  ;;  %v505_v36 = vadd.f32 %v504_v34, %v503_v32 }
 0x118   : > { %v506_v37 = vrot.slane %v505_v36, 1  ;;  %v486_v39 = vadd.f32 %v485_v35, %v484_v33 }
 0x11a   : > { %v507_v40 = vadd.f32 %v506_v37, %v505_v36 }
 0x11c   : > { %v509_v41 = vsel %vm508_vm4, %v486_v39, %v507_v40 }
 0x11d   : > { %v510_v42 = vadd.f32 %v509_v41, %v473_v38 }
 0x11f   : > { %511 = vst [vmem:[%s1042_s6] sm:$0x3] %v510_v42 }
 0x120 PF: > { %s18_s24 = sadd.s32 1, %s892_s24  }
 0x121   : > { %p15_p5 = scmp.ge.s32.totalorder %s18_s24, 4  }
 0x123   :  { %17 = sbr.rel (!%p15_p5) target bundleno = 1 (0x1), region = 101 }

</bundles_post_ra>
